<compile_context>
chip_gen: v7x
topology: tpu7x:2x2x1
jax: 0.10.0
libtpu: 0.0.40
codegen_flags: <defaults>
</compile_context>

<pallas_src>
import functools

import jax
import jax.numpy as jnp
from jax import lax
from jax.experimental import pallas as pl
from jax.experimental.pallas import tpu as pltpu


HEAD_PAD = 128  # lane-dense padded width of the fused [fc | rot_fc] head output


def rotnet_kernel(x_ref, wconv_ref, bconv_ref, wheads_ref, bheads_ref, out_ref,
                  *, h, w, inv_hw):
    # x_ref      : (B_TILE, H+2, W+2, C)  bf16 halo-padded NHWC input tile
    # wconv_ref  : (9, C, Cmid)           bf16 conv weight, one (C, Cmid) slab per tap
    # bconv_ref  : (1, Cmid)              f32
    # wheads_ref : (Cmid, HEAD_PAD)       bf16 fused [fc | rot_fc | zero-pad] weight
    # bheads_ref : (1, HEAD_PAD)          f32
    # out_ref    : (1, B_TILE, HEAD_PAD)  f32 fused head output (lane-dense)
    b_tile, _, _, c = x_ref.shape
    cmid = wconv_ref.shape[2]
    rows = b_tile * h * w

    x = x_ref[...]  # single VMEM load of the whole halo-padded tile

    # ---- backbone conv3x3 'same': in-VMEM im2col as 9 shifted taps, MXU matmuls ----
    acc = jnp.zeros((rows, cmid), jnp.float32)
    for t in range(9):
        ki, kj = divmod(t, 3)
        tap = x[:, ki:ki + h, kj:kj + w, :].reshape(rows, c)          # bf16 (rows, C)
        acc = acc + jnp.dot(tap, wconv_ref[t],
                            preferred_element_type=jnp.float32)      # f32 accumulate

    conv = jnp.maximum(acc + bconv_ref[...], 0.0)                     # bias + ReLU (f32)

    # ---- global average pool per sample: one sublane reduce over the block ----
    feat = jnp.sum(conv.reshape(b_tile, h * w, cmid), axis=1) * inv_hw  # (B_TILE, Cmid)

    # ---- fused [fc | rot_fc] head: (B_TILE, Cmid) x (Cmid, 128) on the MXU ----
    heads = jnp.dot(feat.astype(wheads_ref.dtype), wheads_ref[...],
                    preferred_element_type=jnp.float32) + bheads_ref[...]
    out_ref[...] = heads.reshape(out_ref.shape)


def _tile_padded_bytes(shape, dtype):
    """VMEM footprint of a block, accounting for (sublane, 128-lane) layout padding."""
    itemsize = jnp.dtype(dtype).itemsize
    sub = max(8, 32 // itemsize)              # 8 sublanes for f32, 16 for bf16
    dims = (1, 1) + tuple(int(d) for d in shape)
    lead = 1
    for d in dims[:-2]:
        lead *= d
    sl = pl.cdiv(dims[-2], sub) * sub
    ln = pl.cdiv(dims[-1], 128) * 128
    return lead * sl * ln * itemsize


def _const_spec(shape):
    """BlockSpec for a grid-invariant operand; single-buffered when supported."""
    idx = lambda b: (0,) * len(shape)
    try:
        return pl.BlockSpec(shape, idx, pipeline_mode=pl.Buffered(1))
    except TypeError:  # older BlockSpec without pipeline_mode
        return pl.BlockSpec(shape, idx)


def rotnet_forward(x_nchw, params, return_rot_logits=False, b_tile=8):
    """Equivalent of RotNet.forward(x, return_rot_logits)."""
    n, c, h, w = x_nchw.shape
    hw = h * w
    hp, wp = h + 2, w + 2

    wconv = params['wconv'].astype(jnp.bfloat16)              # (9, C, Cmid)
    bconv = params['bconv'].astype(jnp.float32)               # (1, Cmid)
    cmid = wconv.shape[2]
    num_classes = params['wfc'].shape[1]

    # Fuse fc + rot_fc into one lane-dense head: columns [0:nc) = fc, [nc:nc+4) = rot_fc.
    wheads = jnp.concatenate([params['wfc'], params['wrot']], axis=1)
    bheads = jnp.concatenate([params['bfc'], params['brot']], axis=1)
    pad_cols = HEAD_PAD - wheads.shape[1]
    assert pad_cols >= 0, "num_classes + 4 must fit in the 128-lane head slab"
    wheads = jnp.pad(wheads, ((0, 0), (0, pad_cols))).astype(jnp.bfloat16)
    bheads = jnp.pad(bheads, ((0, 0), (0, pad_cols))).astype(jnp.float32)

    # Batch tiling: amortize grid overhead, but keep >= 2 grid steps when
    # possible so v7x's two TensorCores both get work (a loop on v5e/v6e).
    b_tile = max(1, min(b_tile, n))
    while b_tile > 1 and pl.cdiv(n, b_tile) < 2:
        b_tile //= 2
    n_blk = pl.cdiv(n, b_tile)
    n_pad = n_blk * b_tile

    # Halo-padded NHWC bf16 input: the only HBM-side prep (~1x the input bytes).
    xh = jnp.transpose(x_nchw.astype(jnp.float32), (0, 2, 3, 1)).astype(jnp.bfloat16)
    xh = jnp.pad(xh, ((0, n_pad - n), (1, 1), (1, 1), (0, 0)))

    # VMEM budget with lane/sublane padding: 2x buffers for pipelined input/output,
    # 1x-ish for constant weights, plus headroom for in-kernel f32 temporaries.
    vmem_need = (2 * _tile_padded_bytes((b_tile, hp, wp, c), jnp.bfloat16)
                 + 2 * _tile_padded_bytes((1, b_tile, HEAD_PAD), jnp.float32)
                 + 2 * _tile_padded_bytes((9, c, cmid), jnp.bfloat16)
                 + 2 * _tile_padded_bytes((1, cmid), jnp.float32)
                 + 2 * _tile_padded_bytes((cmid, HEAD_PAD), jnp.bfloat16)
                 + 2 * _tile_padded_bytes((1, HEAD_PAD), jnp.float32)
                 + 6 * _tile_padded_bytes((b_tile * hw, cmid), jnp.float32))
    vmem_limit = int(min(64 * 2**20, max(32 * 2**20, 2 * vmem_need)))

    cost = pl.CostEstimate(
        flops=2 * n_pad * hw * (9 * c) * cmid + 2 * n_pad * cmid * HEAD_PAD,
        transcendentals=0,
        bytes_accessed=(xh.size * 2 + wconv.size * 2 + bconv.size * 4
                        + wheads.size * 2 + bheads.size * 4
                        + n_pad * HEAD_PAD * 4))

    kernel = functools.partial(rotnet_kernel, h=h, w=w, inv_hw=1.0 / hw)

    out = pl.pallas_call(
        kernel,
        out_shape=jax.ShapeDtypeStruct((n_blk, b_tile, HEAD_PAD), jnp.float32),
        grid_spec=pltpu.PrefetchScalarGridSpec(
            num_scalar_prefetch=0,
            grid=(n_blk,),
            in_specs=[
                pl.BlockSpec((b_tile, hp, wp, c), lambda b: (b, 0, 0, 0)),  # input
                _const_spec((9, c, cmid)),                                   # wconv
                _const_spec((1, cmid)),                                      # bconv
                _const_spec((cmid, HEAD_PAD)),                               # wheads
                _const_spec((1, HEAD_PAD)),                                  # bheads
            ],
            out_specs=pl.BlockSpec((1, b_tile, HEAD_PAD), lambda b: (b, 0, 0)),
        ),
        compiler_params=pltpu.CompilerParams(
            dimension_semantics=("parallel",),
            vmem_limit_bytes=vmem_limit),
        cost_estimate=cost,
    )(xh, wconv, bconv, wheads, bheads)

    heads = out.reshape(n_pad, HEAD_PAD)[:n]
    logits = heads[:, :num_classes]
    rot_logits = heads[:, num_classes:num_classes + 4]
    if return_rot_logits:
        return logits, rot_logits
    return logits


def init_params(key, c_in=3, feature_size=32, num_classes=10):
    """Deterministic synthetic parameters (PyTorch layouts, rearranged for the kernel)."""
    ks = jax.random.split(key, 6)
    # conv weight in PyTorch layout (Cout, Cin, 3, 3) -> (KH, KW, Cin, Cout) -> (9, Cin, Cout)
    wconv_pt = jax.random.normal(ks[0], (feature_size, c_in, 3, 3), jnp.float32) * 0.05
    wconv = wconv_pt.transpose(2, 3, 1, 0).reshape(9, c_in, feature_size)
    bconv = jax.random.normal(ks[1], (1, feature_size), jnp.float32) * 0.05
    # fc: Linear(feature_size, num_classes); PyTorch weight (out, in) -> transpose
    wfc_pt = jax.random.normal(ks[2], (num_classes, feature_size), jnp.float32) * 0.05
    bfc = jax.random.normal(ks[3], (1, num_classes), jnp.float32) * 0.05
    # rot_fc: Linear(feature_size, 4)
    wrot_pt = jax.random.normal(ks[4], (4, feature_size), jnp.float32) * 0.05
    brot = jax.random.normal(ks[5], (1, 4), jnp.float32) * 0.05
    return dict(wconv=wconv, bconv=bconv,
                wfc=wfc_pt.T, bfc=bfc, wrot=wrot_pt.T, brot=brot)


def _reference(x_nchw, params):
    """Pure-JAX f32 reference of the same forward (conv -> ReLU -> GAP -> two heads)."""
    c_in = x_nchw.shape[1]
    cmid = params['wconv'].shape[2]
    w_hwio = params['wconv'].reshape(3, 3, c_in, cmid)
    conv = lax.conv_general_dilated(
        x_nchw.astype(jnp.float32), w_hwio, window_strides=(1, 1),
        padding='SAME', dimension_numbers=('NCHW', 'HWIO', 'NHWC'))
    conv = jnp.maximum(conv + params['bconv'], 0.0)
    feat = conv.mean(axis=(1, 2))
    logits = feat @ params['wfc'] + params['bfc']
    rot = feat @ params['wrot'] + params['brot']
    return logits, rot


if __name__ == "__main__":
    key = jax.random.PRNGKey(0)
    kx, kp = jax.random.split(key)

    N, C, H, W = 2, 3, 16, 16            # NCHW, as in the PyTorch module
    num_classes, feature_size = 10, 32
    x = jax.random.normal(kx, (N, C, H, W), jnp.float32)
    params = init_params(kp, c_in=C, feature_size=feature_size,
                         num_classes=num_classes)

    logits, rot_logits = rotnet_forward(x, params, return_rot_logits=True)
    jax.block_until_ready((logits, rot_logits))

    ref_logits, ref_rot = _reference(x, params)
    assert logits.shape == (N, num_classes) and rot_logits.shape == (N, 4)
    # bf16 matmul inputs -> relax tolerance vs. the f32 reference
    assert jnp.allclose(logits, ref_logits, atol=2e-2, rtol=2e-2)
    assert jnp.allclose(rot_logits, ref_rot, atol=2e-2, rtol=2e-2)

    # default path (return_rot_logits=False) returns logits only
    logits_only = rotnet_forward(x, params)
    jax.block_until_ready(logits_only)
    assert logits_only.shape == (N, num_classes)

    print("KERNEL_OK")
</pallas_src>

<mosaic_0001>
module attributes {stable_mosaic.version = 11 : i64} {
  func.func @rotnet_kernel(%arg0: i32, %arg1: memref<1x18x18x3xbf16, #tpu.memory_space<vmem>>, %arg2: memref<9x3x32xbf16, #tpu.memory_space<vmem>>, %arg3: memref<1x32xf32, #tpu.memory_space<vmem>>, %arg4: memref<32x128xbf16, #tpu.memory_space<vmem>>, %arg5: memref<1x128xf32, #tpu.memory_space<vmem>>, %arg6: memref<1x1x128xf32, #tpu.memory_space<vmem>>) attributes {dimension_semantics = [#tpu.dimension_semantics<parallel>], iteration_bounds = array<i64: 2>, scalar_prefetch = 0 : i64, scratch_operands = 0 : i64, tpu.core_type = #tpu.core_type<tc>, window_params = [{transform_indices = @transform_0, window_bounds = array<i64: 1, 18, 18, 3>}, {pipeline_mode = #tpu.pipeline_mode<synchronous>, transform_indices = @transform_1, window_bounds = array<i64: 9, 3, 32>}, {pipeline_mode = #tpu.pipeline_mode<synchronous>, transform_indices = @transform_2, window_bounds = array<i64: 1, 32>}, {pipeline_mode = #tpu.pipeline_mode<synchronous>, transform_indices = @transform_3, window_bounds = array<i64: 32, 128>}, {pipeline_mode = #tpu.pipeline_mode<synchronous>, transform_indices = @transform_4, window_bounds = array<i64: 1, 128>}, {transform_indices = @transform_5, window_bounds = array<i64: 1, 1, 128>}]} {
    %c0 = arith.constant 0 : index
    %c0_0 = arith.constant 0 : index
    %c0_1 = arith.constant 0 : index
    %c0_2 = arith.constant 0 : index
    %0 = vector.load %arg1[%c0, %c0_0, %c0_1, %c0_2] : memref<1x18x18x3xbf16, #tpu.memory_space<vmem>>, vector<1x18x18x3xbf16>
    %cst = arith.constant 0.000000e+00 : f32
    %1 = vector.broadcast %cst : f32 to vector<256x32xf32>
    %2 = vector.extract_strided_slice %0 {offsets = [0, 0, 0, 0], sizes = [1, 16, 16, 3], strides = [1, 1, 1, 1]} : vector<1x18x18x3xbf16> to vector<1x16x16x3xbf16>
    %3 = vector.shape_cast %2 : vector<1x16x16x3xbf16> to vector<256x3xbf16>
    %c0_3 = arith.constant 0 : index
    %c0_4 = arith.constant 0 : index
    %c0_5 = arith.constant 0 : index
    %4 = vector.load %arg2[%c0_3, %c0_4, %c0_5] : memref<9x3x32xbf16, #tpu.memory_space<vmem>>, vector<1x3x32xbf16>
    %5 = vector.shape_cast %4 : vector<1x3x32xbf16> to vector<3x32xbf16>
    %cst_6 = arith.constant dense<0.000000e+00> : vector<256x32xf32>
    %6 = tpu.matmul %3, %5, %cst_6 {dimension_numbers = #tpu.dot_dimension_numbers<[1], [0], [0], [1], [0, 0, 1, 1], [], []>} : vector<256x3xbf16>, vector<3x32xbf16>, vector<256x32xf32> -> vector<256x32xf32>
    %7 = arith.addf %1, %6 : vector<256x32xf32>
    %8 = vector.extract_strided_slice %0 {offsets = [0, 0, 1, 0], sizes = [1, 16, 16, 3], strides = [1, 1, 1, 1]} : vector<1x18x18x3xbf16> to vector<1x16x16x3xbf16>
    %9 = vector.shape_cast %8 : vector<1x16x16x3xbf16> to vector<256x3xbf16>
    %c1 = arith.constant 1 : index
    %c0_7 = arith.constant 0 : index
    %c0_8 = arith.constant 0 : index
    %10 = vector.load %arg2[%c1, %c0_7, %c0_8] : memref<9x3x32xbf16, #tpu.memory_space<vmem>>, vector<1x3x32xbf16>
    %11 = vector.shape_cast %10 : vector<1x3x32xbf16> to vector<3x32xbf16>
    %cst_9 = arith.constant dense<0.000000e+00> : vector<256x32xf32>
    %12 = tpu.matmul %9, %11, %cst_9 {dimension_numbers = #tpu.dot_dimension_numbers<[1], [0], [0], [1], [0, 0, 1, 1], [], []>} : vector<256x3xbf16>, vector<3x32xbf16>, vector<256x32xf32> -> vector<256x32xf32>
    %13 = arith.addf %7, %12 : vector<256x32xf32>
    %14 = vector.extract_strided_slice %0 {offsets = [0, 0, 2, 0], sizes = [1, 16, 16, 3], strides = [1, 1, 1, 1]} : vector<1x18x18x3xbf16> to vector<1x16x16x3xbf16>
    %15 = vector.shape_cast %14 : vector<1x16x16x3xbf16> to vector<256x3xbf16>
    %c2 = arith.constant 2 : index
    %c0_10 = arith.constant 0 : index
    %c0_11 = arith.constant 0 : index
    %16 = vector.load %arg2[%c2, %c0_10, %c0_11] : memref<9x3x32xbf16, #tpu.memory_space<vmem>>, vector<1x3x32xbf16>
    %17 = vector.shape_cast %16 : vector<1x3x32xbf16> to vector<3x32xbf16>
    %cst_12 = arith.constant dense<0.000000e+00> : vector<256x32xf32>
    %18 = tpu.matmul %15, %17, %cst_12 {dimension_numbers = #tpu.dot_dimension_numbers<[1], [0], [0], [1], [0, 0, 1, 1], [], []>} : vector<256x3xbf16>, vector<3x32xbf16>, vector<256x32xf32> -> vector<256x32xf32>
    %19 = arith.addf %13, %18 : vector<256x32xf32>
    %20 = vector.extract_strided_slice %0 {offsets = [0, 1, 0, 0], sizes = [1, 16, 16, 3], strides = [1, 1, 1, 1]} : vector<1x18x18x3xbf16> to vector<1x16x16x3xbf16>
    %21 = vector.shape_cast %20 : vector<1x16x16x3xbf16> to vector<256x3xbf16>
    %c3 = arith.constant 3 : index
    %c0_13 = arith.constant 0 : index
    %c0_14 = arith.constant 0 : index
    %22 = vector.load %arg2[%c3, %c0_13, %c0_14] : memref<9x3x32xbf16, #tpu.memory_space<vmem>>, vector<1x3x32xbf16>
    %23 = vector.shape_cast %22 : vector<1x3x32xbf16> to vector<3x32xbf16>
    %cst_15 = arith.constant dense<0.000000e+00> : vector<256x32xf32>
    %24 = tpu.matmul %21, %23, %cst_15 {dimension_numbers = #tpu.dot_dimension_numbers<[1], [0], [0], [1], [0, 0, 1, 1], [], []>} : vector<256x3xbf16>, vector<3x32xbf16>, vector<256x32xf32> -> vector<256x32xf32>
    %25 = arith.addf %19, %24 : vector<256x32xf32>
    %26 = vector.extract_strided_slice %0 {offsets = [0, 1, 1, 0], sizes = [1, 16, 16, 3], strides = [1, 1, 1, 1]} : vector<1x18x18x3xbf16> to vector<1x16x16x3xbf16>
    %27 = vector.shape_cast %26 : vector<1x16x16x3xbf16> to vector<256x3xbf16>
    %c4 = arith.constant 4 : index
    %c0_16 = arith.constant 0 : index
    %c0_17 = arith.constant 0 : index
    %28 = vector.load %arg2[%c4, %c0_16, %c0_17] : memref<9x3x32xbf16, #tpu.memory_space<vmem>>, vector<1x3x32xbf16>
    %29 = vector.shape_cast %28 : vector<1x3x32xbf16> to vector<3x32xbf16>
    %cst_18 = arith.constant dense<0.000000e+00> : vector<256x32xf32>
    %30 = tpu.matmul %27, %29, %cst_18 {dimension_numbers = #tpu.dot_dimension_numbers<[1], [0], [0], [1], [0, 0, 1, 1], [], []>} : vector<256x3xbf16>, vector<3x32xbf16>, vector<256x32xf32> -> vector<256x32xf32>
    %31 = arith.addf %25, %30 : vector<256x32xf32>
    %32 = vector.extract_strided_slice %0 {offsets = [0, 1, 2, 0], sizes = [1, 16, 16, 3], strides = [1, 1, 1, 1]} : vector<1x18x18x3xbf16> to vector<1x16x16x3xbf16>
    %33 = vector.shape_cast %32 : vector<1x16x16x3xbf16> to vector<256x3xbf16>
    %c5 = arith.constant 5 : index
    %c0_19 = arith.constant 0 : index
    %c0_20 = arith.constant 0 : index
    %34 = vector.load %arg2[%c5, %c0_19, %c0_20] : memref<9x3x32xbf16, #tpu.memory_space<vmem>>, vector<1x3x32xbf16>
    %35 = vector.shape_cast %34 : vector<1x3x32xbf16> to vector<3x32xbf16>
    %cst_21 = arith.constant dense<0.000000e+00> : vector<256x32xf32>
    %36 = tpu.matmul %33, %35, %cst_21 {dimension_numbers = #tpu.dot_dimension_numbers<[1], [0], [0], [1], [0, 0, 1, 1], [], []>} : vector<256x3xbf16>, vector<3x32xbf16>, vector<256x32xf32> -> vector<256x32xf32>
    %37 = arith.addf %31, %36 : vector<256x32xf32>
    %38 = vector.extract_strided_slice %0 {offsets = [0, 2, 0, 0], sizes = [1, 16, 16, 3], strides = [1, 1, 1, 1]} : vector<1x18x18x3xbf16> to vector<1x16x16x3xbf16>
    %39 = vector.shape_cast %38 : vector<1x16x16x3xbf16> to vector<256x3xbf16>
    %c6 = arith.constant 6 : index
    %c0_22 = arith.constant 0 : index
    %c0_23 = arith.constant 0 : index
    %40 = vector.load %arg2[%c6, %c0_22, %c0_23] : memref<9x3x32xbf16, #tpu.memory_space<vmem>>, vector<1x3x32xbf16>
    %41 = vector.shape_cast %40 : vector<1x3x32xbf16> to vector<3x32xbf16>
    %cst_24 = arith.constant dense<0.000000e+00> : vector<256x32xf32>
    %42 = tpu.matmul %39, %41, %cst_24 {dimension_numbers = #tpu.dot_dimension_numbers<[1], [0], [0], [1], [0, 0, 1, 1], [], []>} : vector<256x3xbf16>, vector<3x32xbf16>, vector<256x32xf32> -> vector<256x32xf32>
    %43 = arith.addf %37, %42 : vector<256x32xf32>
    %44 = vector.extract_strided_slice %0 {offsets = [0, 2, 1, 0], sizes = [1, 16, 16, 3], strides = [1, 1, 1, 1]} : vector<1x18x18x3xbf16> to vector<1x16x16x3xbf16>
    %45 = vector.shape_cast %44 : vector<1x16x16x3xbf16> to vector<256x3xbf16>
    %c7 = arith.constant 7 : index
    %c0_25 = arith.constant 0 : index
    %c0_26 = arith.constant 0 : index
    %46 = vector.load %arg2[%c7, %c0_25, %c0_26] : memref<9x3x32xbf16, #tpu.memory_space<vmem>>, vector<1x3x32xbf16>
    %47 = vector.shape_cast %46 : vector<1x3x32xbf16> to vector<3x32xbf16>
    %cst_27 = arith.constant dense<0.000000e+00> : vector<256x32xf32>
    %48 = tpu.matmul %45, %47, %cst_27 {dimension_numbers = #tpu.dot_dimension_numbers<[1], [0], [0], [1], [0, 0, 1, 1], [], []>} : vector<256x3xbf16>, vector<3x32xbf16>, vector<256x32xf32> -> vector<256x32xf32>
    %49 = arith.addf %43, %48 : vector<256x32xf32>
    %50 = vector.extract_strided_slice %0 {offsets = [0, 2, 2, 0], sizes = [1, 16, 16, 3], strides = [1, 1, 1, 1]} : vector<1x18x18x3xbf16> to vector<1x16x16x3xbf16>
    %51 = vector.shape_cast %50 : vector<1x16x16x3xbf16> to vector<256x3xbf16>
    %c8 = arith.constant 8 : index
    %c0_28 = arith.constant 0 : index
    %c0_29 = arith.constant 0 : index
    %52 = vector.load %arg2[%c8, %c0_28, %c0_29] : memref<9x3x32xbf16, #tpu.memory_space<vmem>>, vector<1x3x32xbf16>
    %53 = vector.shape_cast %52 : vector<1x3x32xbf16> to vector<3x32xbf16>
    %cst_30 = arith.constant dense<0.000000e+00> : vector<256x32xf32>
    %54 = tpu.matmul %51, %53, %cst_30 {dimension_numbers = #tpu.dot_dimension_numbers<[1], [0], [0], [1], [0, 0, 1, 1], [], []>} : vector<256x3xbf16>, vector<3x32xbf16>, vector<256x32xf32> -> vector<256x32xf32>
    %55 = arith.addf %49, %54 : vector<256x32xf32>
    %c0_31 = arith.constant 0 : index
    %c0_32 = arith.constant 0 : index
    %56 = vector.load %arg3[%c0_31, %c0_32] : memref<1x32xf32, #tpu.memory_space<vmem>>, vector<1x32xf32>
    %57 = vector.broadcast %56 : vector<1x32xf32> to vector<256x32xf32>
    %58 = arith.addf %55, %57 : vector<256x32xf32>
    %cst_33 = arith.constant 0.000000e+00 : f32
    %59 = vector.broadcast %cst_33 : f32 to vector<256x32xf32>
    %60 = arith.maximumf %58, %59 : vector<256x32xf32>
    %61 = vector.shape_cast %60 : vector<256x32xf32> to vector<1x256x32xf32>
    %cst_34 = arith.constant dense<0.000000e+00> : vector<1x32xf32>
    %62 = vector.multi_reduction <add>, %61, %cst_34 [1] : vector<1x256x32xf32> to vector<1x32xf32>
    %cst_35 = arith.constant 3.906250e-03 : f32
    %63 = vector.broadcast %cst_35 : f32 to vector<1x32xf32>
    %64 = arith.mulf %62, %63 : vector<1x32xf32>
    %65 = arith.truncf %64 : vector<1x32xf32> to vector<1x32xbf16>
    %c0_36 = arith.constant 0 : index
    %c0_37 = arith.constant 0 : index
    %66 = vector.load %arg4[%c0_36, %c0_37] : memref<32x128xbf16, #tpu.memory_space<vmem>>, vector<32x128xbf16>
    %cst_38 = arith.constant dense<0.000000e+00> : vector<1x128xf32>
    %67 = tpu.matmul %65, %66, %cst_38 {dimension_numbers = #tpu.dot_dimension_numbers<[1], [0], [0], [1], [0, 0, 1, 1], [], []>} : vector<1x32xbf16>, vector<32x128xbf16>, vector<1x128xf32> -> vector<1x128xf32>
    %c0_39 = arith.constant 0 : index
    %c0_40 = arith.constant 0 : index
    %68 = vector.load %arg5[%c0_39, %c0_40] : memref<1x128xf32, #tpu.memory_space<vmem>>, vector<1x128xf32>
    %69 = arith.addf %67, %68 : vector<1x128xf32>
    %70 = vector.shape_cast %69 : vector<1x128xf32> to vector<1x1x128xf32>
    %c0_41 = arith.constant 0 : index
    %c0_42 = arith.constant 0 : index
    %c0_43 = arith.constant 0 : index
    %71 = vector.load %arg6[%c0_41, %c0_42, %c0_43] : memref<1x1x128xf32, #tpu.memory_space<vmem>>, vector<1x1x128xf32>
    tpu.vector_store %arg6[%c0_41, %c0_42, %c0_43], %70 {strides = array<i32>} : memref<1x1x128xf32, #tpu.memory_space<vmem>>, vector<1x1x128xf32>,
    return
  }
  func.func @transform_0(%arg0: i32) -> (i32, i32, i32, i32) {
    %c0_i32 = arith.constant 0 : i32
    %c0_i32_0 = arith.constant 0 : i32
    %c0_i32_1 = arith.constant 0 : i32
    %c0_i32_2 = arith.constant 0 : i32
    return %arg0, %c0_i32, %c0_i32_0, %c0_i32_1 : i32, i32, i32, i32
  }
  func.func @transform_1(%arg0: i32) -> (i32, i32, i32) {
    %c0_i32 = arith.constant 0 : i32
    %c0_i32_0 = arith.constant 0 : i32
    %c0_i32_1 = arith.constant 0 : i32
    %c0_i32_2 = arith.constant 0 : i32
    return %c0_i32, %c0_i32_0, %c0_i32_1 : i32, i32, i32
  }
  func.func @transform_2(%arg0: i32) -> (i32, i32) {
    %c0_i32 = arith.constant 0 : i32
    %c0_i32_0 = arith.constant 0 : i32
    %c0_i32_1 = arith.constant 0 : i32
    return %c0_i32, %c0_i32_0 : i32, i32
  }
  func.func @transform_3(%arg0: i32) -> (i32, i32) {
    %c0_i32 = arith.constant 0 : i32
    %c0_i32_0 = arith.constant 0 : i32
    %c0_i32_1 = arith.constant 0 : i32
    return %c0_i32, %c0_i32_0 : i32, i32
  }
  func.func @transform_4(%arg0: i32) -> (i32, i32) {
    %c0_i32 = arith.constant 0 : i32
    %c0_i32_0 = arith.constant 0 : i32
    %c0_i32_1 = arith.constant 0 : i32
    return %c0_i32, %c0_i32_0 : i32, i32
  }
  func.func @transform_5(%arg0: i32) -> (i32, i32, i32) {
    %c0_i32 = arith.constant 0 : i32
    %c0_i32_0 = arith.constant 0 : i32
    %c0_i32_1 = arith.constant 0 : i32
    return %arg0, %c0_i32, %c0_i32_0 : i32, i32, i32
  }
}

</mosaic_0001>

<bundles_post_ra>
// kernel: tpu_custom_call.1
= control target key start
LH: loop header
LB: loop body
LE: loop exit
PB: predicated region body
PF: predicated region fallthrough
CT: control target
= control target key end

     0   :  { %10 = vsyncpa [#allocation3], 0  ;;  %s5486_s0 = inlined_call_operand.vmem [shape: bf16[2,18,18,3], index: 0, kind: input, shape index: {}]   ;;  %s5487_s1 = inlined_call_operand.vmem [shape: bf16[9,3,32], index: 1, kind: input, shape index: {}]   ;;  %s5488_s2 = inlined_call_operand.vmem [shape: f32[1,32], index: 2, kind: input, shape index: {}]   ;;  %s5489_s3 = inlined_call_operand.vmem [shape: bf16[32,128], index: 3, kind: input, shape index: {}]   ;;  %s5490_s4 = inlined_call_operand.vmem [shape: f32[1,128], index: 4, kind: input, shape index: {}]   ;;  %s5491_s5 = inlined_call_operand.hbm [shape: f32[2,1,128], index: 5, kind: output, shape index: {}]  }
   0x1   :  { %12 = vsyncpa [#allocation3 + $0x1], 0  ;;  %s4341_s18 = smov 0   ;;  %s4343_s19 = smov 0  }
   0x2   :  { %s4345_s20 = smov 0   ;;  %s4347_s21 = smov 0  }
   0x3 LB: > { %s4362_s22 = sadd.s32 4294967295, %s4305_s21   ;;  %s3213_s23 = sadd.s32 4294967294, %s4305_s21   ;;  %s4305_s21 = sphi %s4347_s21, %s5577_s21   ;;  %s4301_s20 = sphi %s4345_s20, %s5576_s20   ;;  %s4297_s19 = sphi %s4343_s19, %s5575_s19   ;;  %s4293_s18 = sphi %s4341_s18, %s5574_s18  }
   0x4   : > { %s4366_s24 = sadd.s32 1, %s4305_s21   ;;  %s135_s25 = sadd.s32 1, %s4301_s20 }
   0x5   : > { %s132_s26 = ssub.s32 %s4305_s21, %s4366_s24  ;;  %p145_p0 = scmp.ne.s32.totalorder %s4301_s20, %s4297_s19 }
   0x6   : > { %p133_p1 = scmp.eq.s32.totalorder %s132_s26, 0  ;;  %p146_p2 = scmp.eq.s32.totalorder %s4362_s22, 1 }
   0x7   : > { %p151_p3 = scmp.ne.s32.totalorder %s4297_s19, %s4293_s18  ;;  %p152_p4 = scmp.eq.s32.totalorder %s3213_s23, 1 }
   0x8   : > { %s4377_s27 = scalar_select %p133_p1, %s4301_s20, %s135_s25  }
   0x9   : > { %p4379_p5 = por %p146_p2, %p145_p0  ;;  %p4383_p6 = por %p152_p4, %p151_p3 }
   0xa   : > { %p3216_p7 = scmp.ge.s32.totalorder %s4305_s21, 1  ;;  %p190_p8 = scmp.lt.s32.totalorder %s4305_s21, 3 }
   0xc   : > { %p191_p9 = pnand %p3216_p7, %p190_p8 }
   0xe   : > { %194 = sbr.rel (%p191_p9) target bundleno = 816 (0x330), region = 40 }
  0x15   : > { %vm764_vm0 = vcmask 1040384   ;;  %vm765_vm1 = vcmask 1041408   ;;  %v3350_v0 = vld [vmem:[%s5487_s1 + $0x8] sm:$0x3]  ;;  %p217_p10 = scmp.lt.s32.totalorder %s4362_s22, 1  ;;  %v4307_v1 = vmov 65535  }
  0x16   : > { %v766_v2 = vsel %vm764_vm0, 4294967295, %v4307_v1  ;;  %v3218_v3 = vld [vmem:[%s5487_s1 + $0x2] sm:$0x3]  ;;  %v3369_v5 = vld [vmem:[%s5487_s1 + $0xa] sm:$0x3]  ;;  %vm715_vm4 = vcmask 23552  }
  0x17   : > { %v4396_v4 = vsel %vm765_vm1, %v766_v2, 0  ;;  %s218_s9 = scalar_select %p217_p10, %s4362_s22, 1  ;;  %vm278_vm2 = vsmask.f32 3328  ;;  %v277_v9 = vld [vmem:[%s5487_s1] sm:$0x3] }
  0x18   : > { %5524 = vst [vmem:[#allocation5_spill] sm:$0xff] %v4396_v4  ;;  %v4403_v6 = vand.u32 %v3350_v0, %v4396_v4  ;;  %v769_v7 = vand.u32 %v3218_v3, %v4396_v4  ;;  %v4407_v8 = vand.u32 %v3369_v5, %v4396_v4  ;;  %vm279_vm3 = vsmask.f32 7440  ;;  %v3387_v11 = vld [vmem:[%s5487_s1 + $0xc] sm:$0x3]  ;;  %s215_s23 = sand.u32 1, %s4297_s19  }
  0x19   : > { %s4177_s14 = smul.u32 216, %s218_s9  ;;  %v4413_v10 = vand.u32 %v4396_v4, %v277_v9  ;;  %v3299_v12 = vld [vmem:[%s5487_s1 + $0x4] sm:$0x3]  ;;  %v3405_v13 = vld [vmem:[%s5487_s1 + $0xe] sm:$0x3]  ;;  %v4454_v25 = vand.u32 %v3387_v11, %v4396_v4  ;;  %vm4472_vm5 = vmor %vm278_vm2, %vm279_vm3  ;;  %vm1240_vm6 = vcmask 1042432  }
  0x1a   : > { %5525 = vst [vmem:[#allocation6_spill] sm:$0xff] %v4403_v6  ;;  %3741 = vmatprep.subr.bf16.mxu0 %v4403_v6  ;;  %3605 = vmatprep.subr.bf16.mxu1 %v769_v7  ;;  %v4457_v26 = vand.u32 %v3299_v12, %v4396_v4  ;;  %v4460_v27 = vand.u32 %v3405_v13, %v4396_v4  ;;  %vm1241_vm7 = vcmask 1046532   ;;  %vm4309_vm9 = vmmov 0   ;;  %s216_s6 = scalar_lea.vmem [#allocation2], %s215_s23  ;;  %s3146_s11 = scalar_lea.sflag [#allocation3], %s215_s23 }
  0x1b   : > { %3742 = vmatpush3.bf16.msra.mxu0 %v4403_v6  ;;  %3606 = vmatpush3.bf16.msra.mxu1 %v769_v7  ;;  %s4426_s30 = scalar_lea.vmem %s5486_s0, %s4177_s14  ;;  %vm4694_vm8 = vmor %vm1240_vm6, %vm1241_vm7  ;;  %vm3012_vm10 = vcmask 261120   ;;  %s3158_s7 = sshll.u32 %s216_s6, 4  ;;  %s5446_s7 = int_to_ptr.vmem [resolvable:$true] %s3158_s7 }
  0x1c   : > { %v4432_v14 = vld [vmem:[%s4426_s30] sm:$0xf]  ;;  %v4435_v15 = vld [vmem:[%s4426_s30 + $0x4] sm:$0xf]  ;;  %v225_v16 = vld [vmem:[%s4426_s30 + $0x8] sm:$0x1]  ;;  %3775 = vmatprep.subr.bf16.mxu0 %v4407_v8  ;;  %3639 = vmatprep.subr.bf16.mxu1 %v4413_v10 }
  0x1d   : > { %v282_v17 = vshrl.u32 %v4432_v14, 16  ;;  %v285_v18 = vshll.u32 %v4432_v14, 16  ;;  %v291_v19 = vshll.u32 %v4435_v15, 16  ;;  %v295_v20 = vshrl.u32 %v4435_v15, 16  ;;  %v4445_v21 = vld [vmem:[%s4426_s30 + $0xc] sm:$0xf] }
  0x1e   : > { %v301_v22 = vshll.u32 %v225_v16, 16  ;;  %v4448_v23 = vld [vmem:[%s4426_s30 + $0x10] sm:$0xf]  ;;  %v4451_v24 = vld [vmem:[%s4426_s30 + $0x14] sm:$0x1]  ;;  %5526 = vst [vmem:[#allocation7_spill] sm:$0xff] %v4460_v27 }
  0x1f   : > { %v284_v28 = vrot.slane %v282_v17, 4  ;;  %v287_v29 = vrot.slane %v285_v18, 5  ;;  %v293_v30 = vrot.slane %v291_v19, 5  ;;  %v297_v31 = vrot.slane %v295_v20, 4  ;;  %v4468_v40 = vld [vmem:[%s4426_s30 + $0x18] sm:$0xf] }
  0x20   : > { %v303_v32 = vrot.slane %v301_v22, 5  ;;  %v306_v33 = vshrl.u32 %v4445_v21, 16  ;;  %v309_v34 = vshll.u32 %v4445_v21, 16  ;;  %v315_v35 = vshll.u32 %v4448_v23, 16  ;;  %v4481_v46 = vld [vmem:[%s4426_s30 + $0x1c] sm:$0xf] }
  0x21   : > { %v288_v36 = vor.u32 %v287_v29, %v284_v28  ;;  %v298_v37 = vor.u32 %v297_v31, %v293_v30  ;;  %v319_v38 = vshrl.u32 %v4448_v23, 16  ;;  %v325_v39 = vshll.u32 %v4451_v24, 16  ;;  %v4485_v53 = vld [vmem:[%s4426_s30 + $0x20] sm:$0x1]  ;;  %v4495_v0 = vld [vmem:[%s4426_s30 + $0x24] sm:$0xf] }
  0x22   : > { %v308_v42 = vrot.slane %v306_v33, 4  ;;  %v311_v43 = vrot.slane %v309_v34, 5  ;;  %v317_v44 = vrot.slane %v315_v35, 5  ;;  %v4478_v45 = vcombine.low %v4445_v21, %v4448_v23  ;;  %v4500_v7 = vld [vmem:[%s4426_s30 + $0x28] sm:$0xf]  ;;  %s4310_s12 = smov [#allocation2]  }
  0x23   : > { %v289_v47 = vrot.slane %v288_v36, 4  ;;  %v299_v48 = vrot.slane %v298_v37, 4  ;;  %v321_v49 = vrot.slane %v319_v38, 4  ;;  %v327_v50 = vrot.slane %v325_v39, 5  ;;  %v4508_v16 = vld [vmem:[%s4426_s30 + $0x2c] sm:$0x1] }
  0x24   : > { %v312_v51 = vor.u32 %v311_v43, %v308_v42  ;;  %v330_v54 = vshrl.u32 %v4468_v40, 16  ;;  %v333_v55 = vshll.u32 %v4468_v40, 16  ;;  %v339_v59 = vshll.u32 %v4481_v46, 16  ;;  %v4514_v22 = vld [vmem:[%s4426_s30 + $0x30] sm:$0xf]  ;;  %s4247_s13 = sshll.u32 %s4310_s12, 4  ;;  %s4248_s13 = int_to_ptr.vmem [resolvable:$false] %s4247_s13 }
  0x25   : > { %v294_v56 = vsel %vm4472_vm5, %v289_v47, %v293_v30  ;;  %v304_v57 = vsel %vm4472_vm5, %v299_v48, %v303_v32  ;;  %v322_v58 = vor.u32 %v321_v49, %v317_v44  ;;  %v343_v3 = vshrl.u32 %v4481_v46, 16  ;;  %v4521_v36 = vld [vmem:[%s4426_s30 + $0x34] sm:$0xf]  ;;  %v4528_v42 = vld [vmem:[%s4426_s30 + $0x38] sm:$0x1]  ;;  %s4249_s14 = scalar_lea.vmem %s4248_s13, 32  ;;  %p4250_p0 = scmp.lt.s32.totalorder %s5446_s7, %s4248_s13 }
  0x26   : > { %v3219_v60 = vcombine.low %v294_v56, %v304_v57  ;;  %v313_v61 = vrot.slane %v312_v51, 4  ;;  %v332_v62 = vrot.slane %v330_v54, 4  ;;  %v335_v63 = vrot.slane %v333_v55, 5  ;;  %v4536_v56 = vld [vmem:[%s4426_s30 + $0x3c] sm:$0xf] }
  0x27   : > { %v323_v1 = vrot.slane %v322_v58, 4  ;;  %v341_v2 = vrot.slane %v339_v59, 5  ;;  %v349_v5 = vshll.u32 %v4485_v53, 16  ;;  %v345_v18 = vrot.slane %v343_v3, 4 }
  0x28   : > { %3607 = vmatprep.mubr.msk.bf16.mxu1 %vm715_vm4, %v3219_v60  ;;  %v318_v9 = vsel %vm4472_vm5, %v313_v61, %v317_v44  ;;  %v336_v11 = vor.u32 %v335_v63, %v332_v62  ;;  %v354_v20 = vshrl.u32 %v4495_v0, 16  ;;  %v357_v30 = vshll.u32 %v4495_v0, 16  ;;  %v4543_v61 = vld [vmem:[%s4426_s30 + $0x40] sm:$0xf] }
  0x29   : > { %v328_v17 = vsel %vm4472_vm5, %v323_v1, %v327_v50  ;;  %v351_v19 = vrot.slane %v349_v5, 5  ;;  %v363_v31 = vshll.u32 %v4500_v7, 16  ;;  %v346_v32 = vor.u32 %v345_v18, %v341_v2  ;;  %v4555_v18 = vld [vmem:[%s4426_s30 + $0x44] sm:$0x1] }
  0x2a   : > { %v3220_v28 = vcombine.low %v318_v9, %v328_v17  ;;  %v337_v29 = vrot.slane %v336_v11, 4  ;;  %v356_v33 = vrot.slane %v354_v20, 4  ;;  %v367_v34 = vshrl.u32 %v4500_v7, 16 }
  0x2b   : > { %v373_v35 = vshll.u32 %v4508_v16, 16  ;;  %v359_v38 = vrot.slane %v357_v30, 5  ;;  %v365_v39 = vrot.slane %v363_v31, 5  ;;  %v378_v43 = vshrl.u32 %v4514_v22, 16 }
  0x2c   : > { %3743 = vmatprep.mubr.msk.bf16.mxu0 %vm715_vm4, %v3220_v28  ;;  %3608 = vmatmul.mubr.msk.bf16.vlgmr.msra.gmra.mrb[0].mxu1 %vm715_vm4, %v3220_v28  ;;  %v342_v37 = vsel %vm4472_vm5, %v337_v29, %v341_v2  ;;  %v347_v44 = vrot.slane %v346_v32, 4  ;;  %v369_v47 = vrot.slane %v367_v34, 4  ;;  %v381_v49 = vshll.u32 %v4514_v22, 16  ;;  %v4560_v28 = vld [vmem:[%s4426_s30 + $0x48] sm:$0xf] }
  0x2d   : > { %v375_v48 = vrot.slane %v373_v35, 5  ;;  %3640 = vmatpush3.bf16.msra.mxu1 %v4413_v10  ;;  %v360_v50 = vor.u32 %v359_v38, %v356_v33  ;;  %v380_v51 = vrot.slane %v378_v43, 4  ;;  %v387_v54 = vshll.u32 %v4521_v36, 16  ;;  %v4567_v33 = vld [vmem:[%s4426_s30 + $0x4c] sm:$0xf] }
  0x2e   : > { %v391_v55 = vshrl.u32 %v4521_v36, 16  ;;  %3673 = vmatprep.subr.bf16.mxu1 %v4457_v26  ;;  %v352_v57 = vsel %vm4472_vm5, %v347_v44, %v351_v19  ;;  %v370_v58 = vor.u32 %v369_v47, %v365_v39  ;;  %v383_v59 = vrot.slane %v381_v49, 5  ;;  %v4583_v49 = vld [vmem:[%s4426_s30 + $0x50] sm:$0x1] }
  0x2f   : > { %v397_v60 = vshll.u32 %v4528_v42, 16  ;;  %v4545_v10 = vcombine.low %v342_v37, %v352_v57  ;;  %v361_v62 = vrot.slane %v360_v50, 4  ;;  %v389_v63 = vrot.slane %v387_v54, 5  ;;  %v4588_v54 = vld [vmem:[%s4426_s30 + $0x54] sm:$0xf] }
  0x30   : > { %v393_v1 = vrot.slane %v391_v55, 4  ;;  %v371_v2 = vrot.slane %v370_v58, 4  ;;  %v384_v3 = vor.u32 %v383_v59, %v380_v51  ;;  %v402_v9 = vshrl.u32 %v4536_v56, 16 }
  0x31   : > { %5529 = vst [vmem:[#allocation8_spill] sm:$0xff] %v4545_v10  ;;  %v399_v5 = vrot.slane %v397_v60, 5  ;;  %3744 = vmatmul.mubr.msk.bf16.vlgmr.msra.gmra.mrb[0].mxu0 %vm715_vm4, %v4545_v10  ;;  %3611 = vmatprep.mubr.msk.bf16.mxu1 %vm715_vm4, %v4545_v10  ;;  %v366_v11 = vsel %vm4472_vm5, %v361_v62, %v365_v39  ;;  %v405_v19 = vshll.u32 %v4536_v56, 16  ;;  %v411_v20 = vshll.u32 %v4543_v61, 16  ;;  %v4593_v60 = vld [vmem:[%s4426_s30 + $0x58] sm:$0xf] }
  0x32   : > { %v394_v17 = vor.u32 %v393_v1, %v389_v63  ;;  %3776 = vmatpush3.bf16.msra.mxu0 %v4407_v8  ;;  %v376_v29 = vsel %vm4472_vm5, %v371_v2, %v375_v48  ;;  %v385_v30 = vrot.slane %v384_v3, 4  ;;  %v404_v31 = vrot.slane %v402_v9, 4 }
  0x33   : > { %v415_v32 = vshrl.u32 %v4543_v61, 16  ;;  %v4569_v34 = vcombine.low %v366_v11, %v376_v29  ;;  %v407_v37 = vrot.slane %v405_v19, 5  ;;  %v413_v38 = vrot.slane %v411_v20, 5  ;;  %3809 = vmatprep.subr.bf16.mxu0 %v4454_v25  ;;  %v4606_v29 = vld [vmem:[%s4426_s30 + $0x5c] sm:$0x1] }
  0x34   : > { %v395_v35 = vrot.slane %v394_v17, 4  ;;  %v390_v8 = vsel %vm4472_vm5, %v385_v30, %v389_v63  ;;  %v421_v43 = vshll.u32 %v4555_v18, 16  ;;  %v426_v44 = vshrl.u32 %v4560_v28, 16 }
  0x35   : > { %5530 = vst [vmem:[#allocation9_spill] sm:$0xff] %v4569_v34  ;;  %v417_v39 = vrot.slane %v415_v32, 4  ;;  %3747 = vmatprep.mubr.msk.bf16.mxu0 %vm715_vm4, %v4569_v34  ;;  %3612 = vmatmul.mubr.msk.bf16.gmra.mrb[4].mxu1 %vm715_vm4, %v4569_v34  ;;  %v408_v48 = vor.u32 %v407_v37, %v404_v31  ;;  %v429_v50 = vshll.u32 %v4560_v28, 16  ;;  %v435_v51 = vshll.u32 %v4567_v33, 16  ;;  %v4610_v31 = vld [vmem:[%s4426_s30 + $0x60] sm:$0xf] }
  0x36   : > { %v400_v47 = vsel %vm4472_vm5, %v395_v35, %v399_v5  ;;  %v423_v58 = vrot.slane %v421_v43, 5  ;;  %v428_v59 = vrot.slane %v426_v44, 4  ;;  %v439_v2 = vshrl.u32 %v4567_v33, 16 }
  0x37   : > { %v4590_v55 = vcombine.low %v390_v8, %v400_v47  ;;  %v418_v57 = vor.u32 %v417_v39, %v413_v38  ;;  %v409_v62 = vrot.slane %v408_v48, 4  ;;  %v431_v63 = vrot.slane %v429_v50, 5  ;;  %v4615_v39 = vld [vmem:[%s4426_s30 + $0x64] sm:$0xf] }
  0x38   : > { %v437_v1 = vrot.slane %v435_v51, 5  ;;  %v445_v5 = vshll.u32 %v4583_v49, 16  ;;  %v450_v9 = vshrl.u32 %v4588_v54, 16  ;;  %v453_v11 = vshll.u32 %v4588_v54, 16 }
  0x39   : > { %5531 = vst [vmem:[#allocation10_spill] sm:$0xff] %v4590_v55  ;;  %3615 = vmatprep.mubr.msk.bf16.mxu1 %vm715_vm4, %v4590_v55  ;;  %v419_v3 = vrot.slane %v418_v57, 4  ;;  %3748 = vmatmul.mubr.msk.bf16.gmra.mrb[4].mxu0 %vm715_vm4, %v4590_v55  ;;  %v414_v17 = vsel %vm4472_vm5, %v409_v62, %v413_v38  ;;  %v432_v19 = vor.u32 %v431_v63, %v428_v59  ;;  %v441_v20 = vrot.slane %v439_v2, 4  ;;  %v4629_v62 = vld [vmem:[%s4426_s30 + $0x68] sm:$0x1] }
  0x3a   : > { %v459_v30 = vshll.u32 %v4593_v60, 16  ;;  %v447_v35 = vrot.slane %v445_v5, 5  ;;  %v452_v37 = vrot.slane %v450_v9, 4  ;;  %v455_v8 = vrot.slane %v453_v11, 5 }
  0x3b   : > { %v424_v32 = vsel %vm4472_vm5, %v419_v3, %v423_v58  ;;  %v433_v38 = vrot.slane %v432_v19, 4  ;;  %v442_v44 = vor.u32 %v441_v20, %v437_v1  ;;  %v463_v50 = vshrl.u32 %v4593_v60, 16 }
  0x3c   : > { %v4617_v43 = vcombine.low %v414_v17, %v424_v32  ;;  %v461_v47 = vrot.slane %v459_v30, 5  ;;  %v456_v48 = vor.u32 %v455_v8, %v452_v37  ;;  %v469_v51 = vshll.u32 %v4606_v29, 16  ;;  %v4634_v17 = vld [vmem:[%s4426_s30 + $0x6c] sm:$0xf]  ;;  %v4640_v32 = vld [vmem:[%s4426_s30 + $0x70] sm:$0xf] }
  0x3d   : > { %v474_v57 = vshrl.u32 %v4610_v31, 16  ;;  %v438_v58 = vsel %vm4472_vm5, %v433_v38, %v437_v1  ;;  %v443_v59 = vrot.slane %v442_v44, 4  ;;  %v477_v63 = vshll.u32 %v4610_v31, 16 }
  0x3e   : > { %5532 = vst [vmem:[#allocation11_spill] sm:$0xff] %v4617_v43  ;;  %3751 = vmatprep.mubr.msk.bf16.mxu0 %vm715_vm4, %v4617_v43  ;;  %3616 = vmatmul.mubr.msk.bf16.gmra.mrb[8].mxu1 %vm715_vm4, %v4617_v43  ;;  %v483_v2 = vshll.u32 %v4615_v39, 16  ;;  %v457_v3 = vrot.slane %v456_v48, 4  ;;  %v465_v5 = vrot.slane %v463_v50, 4  ;;  %v471_v9 = vrot.slane %v469_v51, 5 }
  0x3f   : > { %v476_v11 = vrot.slane %v474_v57, 4  ;;  %v448_v1 = vsel %vm4472_vm5, %v443_v59, %v447_v35  ;;  %v479_v19 = vrot.slane %v477_v63, 5  ;;  %v487_v30 = vshrl.u32 %v4615_v39, 16  ;;  %v4648_v51 = vld [vmem:[%s4426_s30 + $0x74] sm:$0x1] }
  0x40   : > { %v485_v20 = vrot.slane %v483_v2, 5  ;;  %v4642_v37 = vcombine.low %v438_v58, %v448_v1  ;;  %v462_v8 = vsel %vm4472_vm5, %v457_v3, %v461_v47  ;;  %v466_v38 = vor.u32 %v465_v5, %v461_v47  ;;  %v4659_v1 = vld [vmem:[%s4426_s30 + $0x78] sm:$0xf] }
  0x41   : > { %v493_v44 = vshll.u32 %v4629_v62, 16  ;;  %v480_v48 = vor.u32 %v479_v19, %v476_v11  ;;  %v489_v50 = vrot.slane %v487_v30, 4  ;;  %v498_v35 = vshrl.u32 %v4634_v17, 16 }
  0x42   : > { %5533 = vst [vmem:[#allocation12_spill] sm:$0xff] %v4642_v37  ;;  %v501_v57 = vshll.u32 %v4634_v17, 16  ;;  %3752 = vmatmul.mubr.msk.bf16.gmra.mrb[8].mxu0 %vm715_vm4, %v4642_v37  ;;  %3619 = vmatprep.mubr.msk.bf16.mxu1 %vm715_vm4, %v4642_v37  ;;  %v467_v58 = vrot.slane %v466_v38, 4  ;;  %v507_v59 = vshll.u32 %v4640_v32, 16  ;;  %v511_v63 = vshrl.u32 %v4640_v32, 16 }
  0x43   : > { %v495_v47 = vrot.slane %v493_v44, 5  ;;  %v481_v2 = vrot.slane %v480_v48, 4  ;;  %v490_v3 = vor.u32 %v489_v50, %v485_v20  ;;  %v500_v5 = vrot.slane %v498_v35, 4  ;;  %v4665_v38 = vld [vmem:[%s4426_s30 + $0x7c] sm:$0xf] }
  0x44   : > { %v503_v11 = vrot.slane %v501_v57, 5  ;;  %v472_v19 = vsel %vm4472_vm5, %v467_v58, %v471_v9  ;;  %v509_v30 = vrot.slane %v507_v59, 5  ;;  %v513_v13 = vrot.slane %v511_v63, 4  ;;  %v4672_v37 = vld [vmem:[%s4426_s30 + $0x80] sm:$0x1] }
  0x45   : > { %v517_v12 = vshll.u32 %v4648_v51, 16  ;;  %v4667_v44 = vcombine.low %v462_v8, %v472_v19  ;;  %v486_v48 = vsel %vm4472_vm5, %v481_v2, %v485_v20  ;;  %v491_v52 = vrot.slane %v490_v3, 4 }
  0x46   : > { %v504_v50 = vor.u32 %v503_v11, %v500_v5  ;;  %v514_v35 = vor.u32 %v513_v13, %v509_v30  ;;  %v522_v9 = vshrl.u32 %v4659_v1, 16  ;;  %v525_v58 = vshll.u32 %v4659_v1, 16  ;;  %v4687_v5 = vld [vmem:[%s4426_s30 + $0x84] sm:$0xf] }
  0x47   : > { %5534 = vst [vmem:[#allocation13_spill] sm:$0xff] %v4667_v44  ;;  %v519_v57 = vrot.slane %v517_v12, 5  ;;  %3755 = vmatprep.mubr.msk.bf16.mxu0 %vm715_vm4, %v4667_v44  ;;  %3620 = vmatmul.mubr.msk.bf16.gmra.mrb[12].mxu1 %vm715_vm4, %v4667_v44  ;;  %v496_v20 = vsel %vm4472_vm5, %v491_v52, %v495_v47  ;;  %v531_v59 = vshll.u32 %v4665_v38, 16  ;;  %v535_v12 = vshrl.u32 %v4665_v38, 16 }
  0x48   : > { %v505_v8 = vrot.slane %v504_v50, 4  ;;  %v4684_v13 = vcombine.low %v486_v48, %v496_v20  ;;  %v515_v63 = vrot.slane %v514_v35, 4  ;;  %v524_v2 = vrot.slane %v522_v9, 4  ;;  %v4707_v9 = vld [vmem:[%s4426_s30 + $0x88] sm:$0xf] }
  0x49   : > { %v527_v3 = vrot.slane %v525_v58, 5  ;;  %v533_v19 = vrot.slane %v531_v59, 5  ;;  %v537_v44 = vrot.slane %v535_v12, 4  ;;  %v541_v52 = vshll.u32 %v4672_v37, 16  ;;  %v4712_v59 = vld [vmem:[%s4426_s30 + $0x8c] sm:$0x1] }
  0x4a   : > { %5535 = vst [vmem:[#allocation14_spill] sm:$0xff] %v4684_v13  ;;  %v510_v11 = vsel %vm4472_vm5, %v505_v8, %v509_v30  ;;  %3756 = vmatmul.mubr.msk.bf16.gmra.mrb[12].mxu0 %vm715_vm4, %v4684_v13  ;;  %3623 = vmatprep.mubr.msk.bf16.mxu1 %vm715_vm4, %v4684_v13  ;;  %v520_v48 = vsel %vm4472_vm5, %v515_v63, %v519_v57  ;;  %v3284_v50 = vrot.slane %v4445_v21, 9  ;;  %v1252_v35 = vrot.slane %v4448_v23, 5 }
  0x4b   : > { %v528_v30 = vor.u32 %v527_v3, %v524_v2  ;;  %v4709_v58 = vcombine.low %v510_v11, %v520_v48  ;;  %v538_v20 = vor.u32 %v537_v44, %v533_v19  ;;  %v543_v8 = vrot.slane %v541_v52, 5 }
  0x4c   : > { %v546_v12 = vshrl.u32 %v4687_v5, 16  ;;  %v1253_v57 = vsel %vm4694_vm8, %v3284_v50, %v1252_v35  ;;  %v1254_v63 = vrot.slane %v1252_v35, 4  ;;  %v549_v21 = vshll.u32 %v4687_v5, 16  ;;  %v4730_v35 = vld [vmem:[%s4426_s30 + $0x90] sm:$0xf] }
  0x4d   : > { %5538 = vst [vmem:[#allocation15_spill] sm:$0xff] %v4709_v58  ;;  %v529_v13 = vrot.slane %v528_v30, 4  ;;  %3759 = vmatprep.mubr.msk.bf16.mxu0 %vm715_vm4, %v4709_v58  ;;  %v539_v23 = vrot.slane %v538_v20, 4  ;;  %v555_v44 = vshll.u32 %v4707_v9, 16  ;;  %v559_v3 = vshrl.u32 %v4707_v9, 16 }
  0x4e   : > { %v548_v2 = vrot.slane %v546_v12, 4  ;;  %v5539_v52 = vrot.slane %v4451_v24, 5  ;;  %v551_v30 = vrot.slane %v549_v21, 5  ;;  %v565_v50 = vshll.u32 %v4712_v59, 16  ;;  %v4739_v24 = vld [vmem:[%s4426_s30 + $0x94] sm:$0xf] }
  0x4f   : > { %v534_v11 = vsel %vm4472_vm5, %v529_v13, %v533_v19  ;;  %3624 = vmatmul.mubr.msk.bf16.gmra.mrb[16].mxu1 %vm715_vm4, %v4709_v58  ;;  %v544_v20 = vsel %vm4472_vm5, %v539_v23, %v543_v8  ;;  %v557_v13 = vrot.slane %v555_v44, 5  ;;  %v561_v19 = vrot.slane %v559_v3, 4  ;;  %v4757_v44 = vld [vmem:[%s4426_s30 + $0x98] sm:$0x1] }
  0x50   : > { %v1256_v48 = vsel %vm4694_vm8, %v1254_v63, %v5539_v52  ;;  %v4741_v43 = vcombine.low %v534_v11, %v544_v20  ;;  %v552_v63 = vor.u32 %v551_v30, %v548_v2  ;;  %v567_v21 = vrot.slane %v565_v50, 5 }
  0x51   : > { %v4736_v12 = vcombine.low %v1253_v57, %v1256_v48  ;;  %v3285_v52 = vrot.slane %v4468_v40, 9  ;;  %v562_v55 = vor.u32 %v561_v19, %v557_v13  ;;  %v5542_v34 = vrot.slane %v4481_v46, 5 }
  0x52   : > { %5541 = vst [vmem:[#allocation17_spill] sm:$0xff] %v4741_v43  ;;  %v570_v10 = vshrl.u32 %v4730_v35, 16  ;;  %v573_v8 = vshll.u32 %v4730_v35, 16  ;;  %3760 = vmatmul.mubr.msk.bf16.gmra.mrb[16].mxu0 %vm715_vm4, %v4741_v43  ;;  %3627 = vmatprep.mubr.msk.bf16.mxu1 %vm715_vm4, %v4741_v43  ;;  %v553_v57 = vrot.slane %v552_v63, 4  ;;  %v583_v3 = vshrl.u32 %v4739_v24, 16 }
  0x53   : > { %5540 = vst [vmem:[#allocation16_spill] sm:$0xff] %v4736_v12  ;;  %v1261_v58 = vrot.slane %v5542_v34, 4  ;;  %v5543_v23 = vmov %v5542_v34  ;;  %v579_v34 = vshll.u32 %v4739_v24, 16  ;;  %3777 = vmatprep.mubr.msk.bf16.mxu0 %vm715_vm4, %v4736_v12  ;;  %v563_v11 = vrot.slane %v562_v55, 4  ;;  %v4772_v43 = vld [vmem:[%s4426_s30 + $0x9c] sm:$0xf] }
  0x54   : > { %v1260_v2 = vsel %vm4694_vm8, %v3285_v52, %v5543_v23  ;;  %v5544_v48 = vrot.slane %v4485_v53, 5  ;;  %v572_v50 = vrot.slane %v570_v10, 4  ;;  %v575_v20 = vrot.slane %v573_v8, 5  ;;  %v4779_v10 = vld [vmem:[%s4426_s30 + $0xa0] sm:$0xf] }
  0x55   : > { %v558_v19 = vsel %vm4472_vm5, %v553_v57, %v557_v13  ;;  %v581_v52 = vrot.slane %v579_v34, 5  ;;  %v585_v23 = vrot.slane %v583_v3, 4  ;;  %v568_v55 = vsel %vm4472_vm5, %v563_v11, %v567_v21 }
  0x56   : > { %v1263_v30 = vsel %vm4694_vm8, %v1261_v58, %v5544_v48  ;;  %v576_v6 = vor.u32 %v575_v20, %v572_v50  ;;  %v589_v53 = vshll.u32 %v4757_v44, 16  ;;  %v3286_v58 = vrot.slane %v4495_v0, 9  ;;  %v4786_v48 = vld [vmem:[%s4426_s30 + $0xa4] sm:$0x1] }
  0x57   : > { %v4769_v63 = vcombine.low %v1260_v2, %v1263_v30  ;;  %v4781_v8 = vcombine.low %v558_v19, %v568_v55  ;;  %v586_v13 = vor.u32 %v585_v23, %v581_v52  ;;  %v1266_v57 = vrot.slane %v4500_v7, 5 }
  0x58   : > { %v1269_v2 = vrot.slane %v4508_v16, 5  ;;  %v577_v34 = vrot.slane %v576_v6, 4  ;;  %v591_v3 = vrot.slane %v589_v53, 5  ;;  %v594_v21 = vshrl.u32 %v4772_v43, 16 }
  0x59   : > { %5545 = vst [vmem:[#allocation18_spill] sm:$0xff] %v4769_v63  ;;  %5546 = vst [vmem:[#allocation19_spill] sm:$0xff] %v4781_v8  ;;  %v597_v11 = vshll.u32 %v4772_v43, 16  ;;  %3628 = vmatmul.mubr.msk.bf16.gmra.mrb[20].mxu1 %vm715_vm4, %v4781_v8  ;;  %v587_v30 = vrot.slane %v586_v13, 4  ;;  %v1267_v50 = vsel %vm4694_vm8, %v3286_v58, %v1266_v57  ;;  %v1268_v20 = vrot.slane %v1266_v57, 4 }
  0x5a   : > { %v603_v19 = vshll.u32 %v4779_v10, 16  ;;  %v582_v6 = vsel %vm4472_vm5, %v577_v34, %v581_v52  ;;  %v596_v16 = vrot.slane %v594_v21, 4  ;;  %v607_v55 = vshrl.u32 %v4779_v10, 16  ;;  %3778 = vmatmul.mubr.msk.bf16.vlgmr.msra.gmra.mrb[0].mxu0 %vm715_vm4, %v4769_v63  ;;  %v4806_v8 = vld [vmem:[%s4426_s30 + $0xa8] sm:$0xf] }
  0x5b   : > { %v599_v23 = vrot.slane %v597_v11, 5  ;;  %v592_v53 = vsel %vm4472_vm5, %v587_v30, %v591_v3  ;;  %v1270_v58 = vsel %vm4694_vm8, %v1268_v20, %v1269_v2  ;;  %v613_v57 = vshll.u32 %v4786_v48, 16  ;;  %5547 = vst [vmem:[#allocation20_spill] sm:$0xff] %v4806_v8  ;;  %3810 = vmatpush3.bf16.msra.mxu0 %v4454_v25  ;;  %v4814_v63 = vld [vmem:[%s4426_s30 + $0xac] sm:$0xf] }
  0x5c   : > { %v605_v13 = vrot.slane %v603_v19, 5  ;;  %v4809_v52 = vcombine.low %v582_v6, %v592_v53  ;;  %v4811_v34 = vcombine.low %v1267_v50, %v1270_v58  ;;  %v609_v11 = vrot.slane %v607_v55, 4  ;;  %3843 = vmatprep.subr.bf16.mxu0 %v4460_v27  ;;  %v4825_v19 = vld [vmem:[%s4426_s30 + $0xb0] sm:$0x1] }
  0x5d   : > { %v600_v21 = vor.u32 %v599_v23, %v596_v16  ;;  %v615_v3 = vrot.slane %v613_v57, 5  ;;  %v3287_v30 = vrot.slane %v4514_v22, 9  ;;  %v1273_v2 = vrot.slane %v4521_v36, 5  ;;  %5550 = vst [vmem:[#allocation23_spill] sm:$0xff] %v4825_v19 }
  0x5e   : > { %5548 = vst [vmem:[#allocation21_spill] sm:$0xff] %v4809_v52  ;;  %5549 = vst [vmem:[#allocation22_spill] sm:$0xff] %v4811_v34  ;;  %v1276_v20 = vrot.slane %v4528_v42, 5  ;;  %3631 = vmatprep.mubr.msk.bf16.mxu1 %vm715_vm4, %v4809_v52  ;;  %3781 = vmatprep.mubr.msk.bf16.mxu0 %vm715_vm4, %v4811_v34  ;;  %v610_v50 = vor.u32 %v609_v11, %v605_v13  ;;  %v618_v6 = vshrl.u32 %v4806_v8, 16  ;;  %v621_v16 = vshll.u32 %v4806_v8, 16 }
  0x5f   : > { %v601_v25 = vrot.slane %v600_v21, 4  ;;  %v1274_v42 = vsel %vm4694_vm8, %v3287_v30, %v1273_v2  ;;  %v1275_v23 = vrot.slane %v1273_v2, 4  ;;  %v627_v55 = vshll.u32 %v4814_v63, 16  ;;  %v4839_v2 = vld [vmem:[%s4426_s30 + $0xb4] sm:$0xf] }
  0x60   : > { %v631_v53 = vshrl.u32 %v4814_v63, 16  ;;  %v611_v57 = vrot.slane %v610_v50, 4  ;;  %v620_v21 = vrot.slane %v618_v6, 4  ;;  %v623_v11 = vrot.slane %v621_v16, 5 }
  0x61   : > { %v606_v58 = vsel %vm4472_vm5, %v601_v25, %v605_v13  ;;  %v1277_v52 = vsel %vm4694_vm8, %v1275_v23, %v1276_v20  ;;  %v629_v34 = vrot.slane %v627_v55, 5  ;;  %v637_v30 = vshll.u32 %v4825_v19, 16  ;;  %v4847_v25 = vld [vmem:[%s4426_s30 + $0xb8] sm:$0xf] }
  0x62   : > { %v633_v12 = vrot.slane %v631_v53, 4  ;;  %v616_v27 = vsel %vm4472_vm5, %v611_v57, %v615_v3  ;;  %v4843_v4 = vcombine.low %v1274_v42, %v1277_v52  ;;  %v624_v8 = vor.u32 %v623_v11, %v620_v21  ;;  %v4856_v3 = vld [vmem:[%s4426_s30 + $0xbc] sm:$0x1] }
  0x63   : > { %v3288_v13 = vrot.slane %v4536_v56, 9  ;;  %v4849_v50 = vcombine.low %v606_v58, %v616_v27  ;;  %v639_v6 = vrot.slane %v637_v30, 5  ;;  %v1280_v16 = vrot.slane %v4543_v61, 5 }
  0x64   : > { %5551 = vst [vmem:[#allocation24_spill] sm:$0xff] %v4843_v4  ;;  %v634_v20 = vor.u32 %v633_v12, %v629_v34  ;;  %3782 = vmatmul.mubr.msk.bf16.gmra.mrb[4].mxu0 %vm715_vm4, %v4843_v4  ;;  %v625_v23 = vrot.slane %v624_v8, 4  ;;  %v1283_v55 = vrot.slane %v4555_v18, 5  ;;  %v642_v52 = vshrl.u32 %v4839_v2, 16 }
  0x65   : > { %5552 = vst [vmem:[#allocation25_spill] sm:$0xff] %v4849_v50  ;;  %v645_v42 = vshll.u32 %v4839_v2, 16  ;;  %3632 = vmatmul.mubr.msk.bf16.gmra.mrb[24].mxu1 %vm715_vm4, %v4849_v50  ;;  %v1281_v12 = vsel %vm4694_vm8, %v3288_v13, %v1280_v16  ;;  %v1282_v53 = vrot.slane %v1280_v16, 4  ;;  %v651_v58 = vshll.u32 %v4847_v25, 16 }
  0x66   : > { %v635_v27 = vrot.slane %v634_v20, 4  ;;  %v630_v8 = vsel %vm4472_vm5, %v625_v23, %v629_v34  ;;  %v644_v18 = vrot.slane %v642_v52, 4  ;;  %v655_v21 = vshrl.u32 %v4847_v25, 16 }
  0x67   : > { %v647_v57 = vrot.slane %v645_v42, 5  ;;  %v1284_v30 = vsel %vm4694_vm8, %v1282_v53, %v1283_v55  ;;  %v653_v20 = vrot.slane %v651_v58, 5  ;;  %v661_v50 = vshll.u32 %v4856_v3, 16 }
  0x68   : > { %v640_v11 = vsel %vm4472_vm5, %v635_v27, %v639_v6  ;;  %v4875_v16 = vcombine.low %v1281_v12, %v1284_v30  ;;  %v657_v19 = vrot.slane %v655_v21, 4  ;;  %v3289_v23 = vrot.slane %v4560_v28, 9 }
  0x69   : > { %v4873_v13 = vcombine.low %v630_v8, %v640_v11  ;;  %v648_v4 = vor.u32 %v647_v57, %v644_v18  ;;  %v663_v34 = vrot.slane %v661_v50, 5  ;;  %v1287_v52 = vrot.slane %v4567_v33, 5 }
  0x6a   : > { %v1290_v42 = vrot.slane %v4583_v49, 5  ;;  %3785 = vmatprep.mubr.msk.bf16.mxu0 %vm715_vm4, %v4875_v16  ;;  %v658_v55 = vor.u32 %v657_v19, %v653_v20  ;;  %v3290_v27 = vrot.slane %v4588_v54, 9  ;;  %v1294_v12 = vrot.slane %v4593_v60, 5 }
  0x6b   : > { %3635 = vmatprep.mubr.msk.bf16.mxu1 %vm715_vm4, %v4873_v13  ;;  %v649_v6 = vrot.slane %v648_v4, 4  ;;  %v1288_v50 = vsel %vm4694_vm8, %v3289_v23, %v1287_v52  ;;  %v1289_v53 = vrot.slane %v1287_v52, 4  ;;  %v3251_v58 = vcombine.low %v4432_v14, %v4435_v15 }
  0x6c   : > { %v1297_v49 = vrot.slane %v4606_v29, 5  ;;  %v659_v18 = vrot.slane %v658_v55, 4  ;;  %v1295_v4 = vsel %vm4694_vm8, %v3290_v27, %v1294_v12  ;;  %v1296_v19 = vrot.slane %v1294_v12, 4 }
  0x6d   : > { %v654_v8 = vsel %vm4472_vm5, %v649_v6, %v653_v20  ;;  %v1291_v57 = vsel %vm4694_vm8, %v1289_v53, %v1290_v42  ;;  %v3291_v21 = vrot.slane %v4610_v31, 9  ;;  %v1301_v11 = vrot.slane %v4615_v39, 5 }
  0x6e   : > { %v1304_v30 = vrot.slane %v4629_v62, 5  ;;  %v664_v14 = vsel %vm4472_vm5, %v659_v18, %v663_v34  ;;  %v4902_v15 = vcombine.low %v1288_v50, %v1291_v57  ;;  %v1298_v29 = vsel %vm4694_vm8, %v1296_v19, %v1297_v49 }
  0x6f   : > { %v3292_v20 = vrot.slane %v4634_v17, 9  ;;  %v4907_v23 = vcombine.low %v654_v8, %v664_v14  ;;  %v4909_v52 = vcombine.low %v1295_v4, %v1298_v29  ;;  %v1303_v42 = vrot.slane %v1301_v11, 4 }
  0x70   : > { %3786 = vmatmul.mubr.msk.bf16.gmra.mrb[8].mxu0 %vm715_vm4, %v4902_v15  ;;  %v1308_v62 = vrot.slane %v4640_v32, 5  ;;  %v1311_v6 = vrot.slane %v4648_v51, 5  ;;  %v1302_v34 = vsel %vm4694_vm8, %v3291_v21, %v1301_v11  ;;  %v1315_v27 = vrot.slane %v4665_v38, 5 }
  0x71   : > { %3636 = vmatmul.mubr.msk.bf16.gmra.mrb[28].mxu1 %vm715_vm4, %v4907_v23  ;;  %3789 = vmatprep.mubr.msk.bf16.mxu0 %vm715_vm4, %v4909_v52  ;;  %v1305_v55 = vsel %vm4694_vm8, %v1303_v42, %v1304_v30  ;;  %v1322_v50 = vrot.slane %v4707_v9, 5  ;;  %v3293_v18 = vrot.slane %v4659_v1, 9  ;;  %v1318_v19 = vrot.slane %v4672_v37, 5 }
  0x72   : > { %3641 = vmatprep.mubr.msk.bf16.mxu1 %vm715_vm4, %v3251_v58  ;;  %v1309_v12 = vsel %vm4694_vm8, %v3292_v20, %v1308_v62  ;;  %v1310_v51 = vrot.slane %v1308_v62, 4  ;;  %v4928_v53 = vcombine.low %v1302_v34, %v1305_v55  ;;  %v1317_v4 = vrot.slane %v1315_v27, 4 }
  0x73   : > { %v4938_v58 = vcombine.low %v4468_v40, %v4481_v46  ;;  %v3294_v57 = vrot.slane %v4687_v5, 9  ;;  %v1324_v21 = vrot.slane %v1322_v50, 4  ;;  %v1325_v11 = vrot.slane %v4712_v59, 5 }
  0x74   : > { %v1312_v49 = vsel %vm4694_vm8, %v1310_v51, %v1311_v6  ;;  %v1329_v30 = vrot.slane %v4739_v24, 5  ;;  %v4947_v14 = vcombine.low %v4588_v54, %v4593_v60  ;;  %v1316_v40 = vsel %vm4694_vm8, %v3293_v18, %v1315_v27  ;;  %v5555_v51 = vld [vmem:[#allocation23_spill] sm:$0xff] }
  0x75   : > { %v4932_v8 = vcombine.low %v1309_v12, %v1312_v49  ;;  %v1319_v46 = vsel %vm4694_vm8, %v1317_v4, %v1318_v19  ;;  %v1323_v37 = vsel %vm4694_vm8, %v3294_v57, %v1322_v50  ;;  %v1326_v54 = vsel %vm4694_vm8, %v1324_v21, %v1325_v11  ;;  %v5051_v21 = vld [vmem:[%s4426_s30 + $0xc4] sm:$0xf] }
  0x76   : > { %v1336_v60 = vrot.slane %v4779_v10, 5  ;;  %v4967_v59 = vcombine.low %v4610_v31, %v4615_v39  ;;  %v4971_v29 = vcombine.low %v4495_v0, %v4500_v7  ;;  %v4975_v20 = vcombine.low %v4634_v17, %v4640_v32  ;;  %v3332_v32 = vld [vmem:[%s5487_s1 + $0x6] sm:$0x3] }
  0x77   : > { %v4977_v42 = vcombine.low %v1316_v40, %v1319_v46  ;;  %v4981_v62 = vcombine.low %v4514_v22, %v4521_v36  ;;  %v1331_v6 = vrot.slane %v1329_v30, 4  ;;  %v4984_v34 = vcombine.low %v1323_v37, %v1326_v54 }
  0x78   : > { %3790 = vmatmul.mubr.msk.bf16.gmra.mrb[12].mxu0 %vm715_vm4, %v4928_v53  ;;  %v1332_v31 = vrot.slane %v4757_v44, 5  ;;  %v3296_v0 = vrot.slane %v4772_v43, 9  ;;  %v1339_v7 = vrot.slane %v4786_v48, 5  ;;  %v1338_v39 = vrot.slane %v1336_v60, 4 }
  0x79   : > { %3642 = vmatmul.mubr.msk.bf16.vlgmr.msra.gmra.mrb[0].mxu1 %vm715_vm4, %v4478_v45  ;;  %3793 = vmatprep.mubr.msk.bf16.mxu0 %vm715_vm4, %v4932_v8  ;;  %v4991_v17 = vcombine.low %v4659_v1, %v4665_v38  ;;  %v4995_v22 = vcombine.low %v4687_v5, %v4707_v9  ;;  %v4999_v36 = vcombine.low %v4730_v35, %v4739_v24  ;;  %v5553_v38 = vld [vmem:[#allocation20_spill] sm:$0xff]  ;;  %v1350_v24 = vrot.slane %v4847_v25, 5 }
  0x7a   : > { %3645 = vmatprep.mubr.msk.bf16.mxu1 %vm715_vm4, %v4938_v58  ;;  %3674 = vmatpush3.bf16.msra.mxu1 %v4457_v26  ;;  %v3295_v26 = vrot.slane %v4730_v35, 9  ;;  %v5010_v1 = vcombine.low %v4772_v43, %v4779_v10  ;;  %v5014_v5 = vcombine.low %v5553_v38, %v4814_v63  ;;  %v5018_v9 = vcombine.low %v4839_v2, %v4847_v25  ;;  %v5554_v10 = vld [vmem:[#allocation5_spill] sm:$0xff] }
  0x7b   : > { %v1333_v35 = vsel %vm4694_vm8, %v1331_v6, %v1332_v31  ;;  %v1343_v43 = vrot.slane %v4814_v63, 5  ;;  %v5029_v48 = vand.u32 %v3332_v32, %v5554_v10  ;;  %v1337_v55 = vsel %vm4694_vm8, %v3296_v0, %v1336_v60 }
  0x7c   : > { %v1330_v44 = vsel %vm4694_vm8, %v3295_v26, %v1329_v30  ;;  %v1340_v27 = vsel %vm4694_vm8, %v1338_v39, %v1339_v7  ;;  %v5039_v12 = vcombine.low %v4536_v56, %v4543_v61  ;;  %v3297_v25 = vrot.slane %v5553_v38, 9  ;;  %v273_v30 = vld [vmem:[%s4426_s30 + $0xc8] sm:$0x1] }
  0x7d   : > { %3707 = vmatprep.subr.bf16.mxu1 %v5029_v48  ;;  %v5042_v63 = vcombine.low %v1330_v44, %v1333_v35  ;;  %v1346_v50 = vrot.slane %v5555_v51, 5  ;;  %v3298_v49 = vrot.slane %v4839_v2, 9  ;;  %v5047_v18 = vcombine.low %v1337_v55, %v1340_v27  ;;  %v5062_v2 = vld [vmem:[%s4426_s30 + $0xc0] sm:$0xf] }
  0x7e   : > { %v1345_v4 = vrot.slane %v1343_v43, 4  ;;  %v1352_v19 = vrot.slane %v1350_v24, 4  ;;  %v1353_v57 = vrot.slane %v4856_v3, 5  ;;  %v5055_v56 = vcombine.low %v4560_v28, %v4567_v33 }
  0x7f   : > { %v1344_v61 = vsel %vm4694_vm8, %v3297_v25, %v1343_v43  ;;  %v2086_v11 = vrot.slane %v5051_v21, 5  ;;  %v1351_v33 = vsel %vm4694_vm8, %v3298_v49, %v1350_v24  ;;  %v3368_v40 = vrot.slane %v5062_v2, 9 }
  0x80   : > { %3794 = vmatmul.mubr.msk.bf16.gmra.mrb[16].mxu0 %vm715_vm4, %v4977_v42  ;;  %v1347_v28 = vsel %vm4694_vm8, %v1345_v4, %v1346_v50  ;;  %v1354_v3 = vsel %vm4694_vm8, %v1352_v19, %v1353_v57  ;;  %v2089_v60 = vrot.slane %v273_v30, 5  ;;  %v1856_v26 = vshrl.u32 %v5062_v2, 16  ;;  %v3424_v57 = vld [vmem:[%s5487_s1 + $0x10] sm:$0x3] }
  0x81   : > { %3646 = vmatmul.mubr.msk.bf16.gmra.mrb[4].mxu1 %vm715_vm4, %v4971_v29  ;;  %3797 = vmatprep.mubr.msk.bf16.mxu0 %vm715_vm4, %v4984_v34  ;;  %v5079_v46 = vcombine.low %v1344_v61, %v1347_v28  ;;  %v5081_v37 = vcombine.low %v1351_v33, %v1354_v3  ;;  %v2088_v54 = vrot.slane %v2086_v11, 4  ;;  %v1859_v6 = vshll.u32 %v5062_v2, 16  ;;  %v4240_v28 = vld [vmem:[%s4426_s30 + $0x4] sm:$0xf]  ;;  %v4241_v3 = vld [vmem:[%s4426_s30 + $0x8] sm:$0x1] }
  0x82   : > { %3649 = vmatprep.mubr.msk.bf16.mxu1 %vm715_vm4, %v4981_v62  ;;  %v1865_v31 = vshll.u32 %v5051_v21, 16  ;;  %v1869_v0 = vshrl.u32 %v5051_v21, 16  ;;  %v1858_v7 = vrot.slane %v1856_v26, 4  ;;  %v2087_v38 = vsel %vm4694_vm8, %v3368_v40, %v2086_v11  ;;  %v5556_v11 = vld [vmem:[#allocation7_spill] sm:$0xff] }
  0x83   : > { %v1861_v39 = vrot.slane %v1859_v6, 5  ;;  %v2090_v35 = vsel %vm4694_vm8, %v2088_v54, %v2089_v60  ;;  %v1875_v55 = vshll.u32 %v273_v30, 16  ;;  %v2746_v61 = vand.u32 %v3424_v57, %v5554_v10  ;;  %v4242_v10 = vld [vmem:[%s4426_s30] sm:$0xf] }
  0x84   : > { %v1867_v32 = vrot.slane %v1865_v31, 5  ;;  %v1871_v44 = vrot.slane %v1869_v0, 4  ;;  %v5099_v50 = vcombine.low %v2087_v38, %v2090_v35  ;;  %v1245_v33 = vrot.slane %v4240_v28, 5  ;;  %v5557_v31 = vld [vmem:[#allocation16_spill] sm:$0xff]  ;;  %v5558_v0 = vld [vmem:[#allocation18_spill] sm:$0xff]  ;;  %v5563_v35 = vld [vmem:[#allocation9_spill] sm:$0xff] }
  0x85   : > { %v1862_v43 = vor.u32 %v1861_v39, %v1858_v7  ;;  %v1877_v51 = vrot.slane %v1875_v55, 5  ;;  %v1248_v30 = vrot.slane %v4241_v3, 5  ;;  %v3283_v40 = vrot.slane %v4242_v10, 9  ;;  %v5559_v7 = vld [vmem:[#allocation6_spill] sm:$0xff]  ;;  %v5566_v55 = vld [vmem:[#allocation12_spill] sm:$0xff]  ;;  %v5573_v10 = vld [vmem:[#allocation25_spill] sm:$0xff] }
  0x86   : > { %v1872_v24 = vor.u32 %v1871_v44, %v1867_v32  ;;  %v1247_v54 = vrot.slane %v1245_v33, 4  ;;  %v5560_v39 = vld [vmem:[#allocation22_spill] sm:$0xff] }
  0x87   : > { %v1863_v27 = vrot.slane %v1862_v43, 4  ;;  %v1246_v60 = vsel %vm4694_vm8, %v3283_v40, %v1245_v33  ;;  %v5187_v44 = vld [vmem:[%s4426_s30 + $0xcc] sm:$0xf]  ;;  %v5190_v38 = vld [vmem:[%s4426_s30 + $0xd0] sm:$0xf] }
  0x88   : > { %3798 = vmatmul.mubr.msk.bf16.gmra.mrb[20].mxu0 %vm715_vm4, %v5042_v63  ;;  %v1873_v25 = vrot.slane %v1872_v24, 4  ;;  %v1249_v26 = vsel %vm4694_vm8, %v1247_v54, %v1248_v30  ;;  %v5564_v43 = vld [vmem:[#allocation10_spill] sm:$0xff]  ;;  %v5565_v24 = vld [vmem:[#allocation11_spill] sm:$0xff]  ;;  %v2505_v57 = vshll.u32 %v5187_v44, 16  ;;  %v2732_v41 = vrot.slane %v5190_v38, 5 }
  0x89   : > { %3650 = vmatmul.mubr.msk.bf16.gmra.mrb[8].mxu1 %vm715_vm4, %v5039_v12  ;;  %3801 = vmatprep.mubr.msk.bf16.mxu0 %vm715_vm4, %v5047_v18  ;;  %v1868_v49 = vsel %vm4472_vm5, %v1863_v27, %v1867_v32  ;;  %v3300_v6 = vcombine.low %v1246_v60, %v1249_v26  ;;  %v5561_v32 = vld [vmem:[#allocation24_spill] sm:$0xff]  ;;  %v5567_v27 = vld [vmem:[#allocation13_spill] sm:$0xff]  ;;  %v276_v30 = vld [vmem:[%s4426_s30 + $0xd4] sm:$0x1]  ;;  %s3446_s30 = sshll.u32 %s4362_s22, 4  ;;  %s4243_s22 = scalar_lea.vmem %s5446_s7, 16 }
  0x8a   : > { %3653 = vmatprep.mubr.msk.bf16.mxu1 %vm715_vm4, %v5055_v56  ;;  %v1878_v4 = vsel %vm4472_vm5, %v1873_v25, %v1877_v51  ;;  %v5568_v25 = vld [vmem:[#allocation14_spill] sm:$0xff]  ;;  %v5569_v51 = vld [vmem:[#allocation15_spill] sm:$0xff]  ;;  %v2507_v28 = vrot.slane %v2505_v57, 5  ;;  %v2521_v54 = vshll.u32 %v276_v30, 16  ;;  %s5444_s10 = scalar_lea.hbm %s5491_s5, %s3446_s30  ;;  %p4244_p11 = scmp.ne.s32.totalorder %s5446_s7, %s4243_s22 }
  0x8b   : > { %v5105_v19 = vcombine.low %v1868_v49, %v1878_v4  ;;  %v5570_v49 = vld [vmem:[#allocation17_spill] sm:$0xff]  ;;  %v5571_v4 = vld [vmem:[#allocation19_spill] sm:$0xff]  ;;  %p4251_p1 = scmp.lt.s32.totalorder %s4249_s14, %s4243_s22 }
  0x8c   : > { %v2523_v26 = vrot.slane %v2521_v54, 5  ;;  %p4245_p12 = pnand %p4244_p11, %p4379_p5 }
  0x8d   : > { %p4252_p2 = por %p4251_p1, %p4250_p0 }
  0x8e   : > { %p4246_p13 = pneg %p4245_p12 }
  0x90   : > { %3802 = vmatmul.mubr.msk.bf16.gmra.mrb[24].mxu0 %vm715_vm4, %v5079_v46  ;;  %p4253_p3 = pnand %p4252_p2, %p4246_p13 }
  0x91   : > { %3654 = vmatmul.mubr.msk.bf16.gmra.mrb[12].mxu1 %vm715_vm4, %v4947_v14  ;;  %3805 = vmatprep.mubr.msk.bf16.mxu0 %vm715_vm4, %v5081_v37 }
  0x92   : > { %3657 = vmatprep.mubr.msk.bf16.mxu1 %vm715_vm4, %v4967_v59 }
  0x98   : > { %3806 = vmatmul.mubr.msk.bf16.gmra.mrb[28].mxu0 %vm715_vm4, %v5099_v50 }
  0x99   : > { %3658 = vmatmul.mubr.msk.bf16.gmra.mrb[16].mxu1 %vm715_vm4, %v4975_v20  ;;  %3811 = vmatprep.mubr.msk.bf16.mxu0 %vm715_vm4, %v4938_v58 }
  0x9a   : > { %3661 = vmatprep.mubr.msk.bf16.mxu1 %vm715_vm4, %v4991_v17 }
  0xa0   : > { %3812 = vmatmul.mubr.msk.bf16.vlgmr.msra.gmra.mrb[0].mxu0 %vm715_vm4, %v4971_v29 }
  0xa1   : > { %3662 = vmatmul.mubr.msk.bf16.gmra.mrb[20].mxu1 %vm715_vm4, %v4995_v22  ;;  %3844 = vmatpush3.bf16.msra.mxu0 %v5556_v11  ;;  %v2511_v11 = vshll.u32 %v5190_v38, 16 }
  0xa2   : > { %3665 = vmatprep.mubr.msk.bf16.mxu1 %vm715_vm4, %v4999_v36  ;;  %3815 = vmatprep.mubr.msk.bf16.mxu0 %vm715_vm4, %v4981_v62 }
  0xa3   : > { %3877 = vmatprep.subr.bf16.mxu0 %v2746_v61  ;;  %v2513_v33 = vrot.slane %v2511_v11, 5 }
  0xa8   : > { %3816 = vmatmul.mubr.msk.bf16.gmra.mrb[4].mxu0 %vm715_vm4, %v5039_v12 }
  0xa9   : > { %3666 = vmatmul.mubr.msk.bf16.gmra.mrb[24].mxu1 %vm715_vm4, %v5010_v1  ;;  %3819 = vmatprep.mubr.msk.bf16.mxu0 %vm715_vm4, %v5055_v56 }
  0xaa   : > { %3669 = vmatprep.mubr.msk.bf16.mxu1 %vm715_vm4, %v5014_v5 }
  0xb0   : > { %3820 = vmatmul.mubr.msk.bf16.gmra.mrb[8].mxu0 %vm715_vm4, %v4947_v14 }
  0xb1   : > { %3670 = vmatmul.mubr.msk.bf16.gmra.mrb[28].mxu1 %vm715_vm4, %v5018_v9  ;;  %3823 = vmatprep.mubr.msk.bf16.mxu0 %vm715_vm4, %v4967_v59 }
  0xb2   : > { %3675 = vmatprep.mubr.msk.bf16.mxu1 %vm715_vm4, %v3300_v6 }
  0xb8   : > { %3824 = vmatmul.mubr.msk.bf16.gmra.mrb[12].mxu0 %vm715_vm4, %v4975_v20 }
  0xb9   : > { %3676 = vmatmul.mubr.msk.bf16.vlgmr.msra.gmra.mrb[0].mxu1 %vm715_vm4, %v5557_v31  ;;  %3827 = vmatprep.mubr.msk.bf16.mxu0 %vm715_vm4, %v4991_v17 }
  0xba   : > { %3679 = vmatprep.mubr.msk.bf16.mxu1 %vm715_vm4, %v5558_v0  ;;  %3708 = vmatpush3.bf16.msra.mxu1 %v5029_v48  ;;  %v5178_v48 = vcombine.low %v5062_v2, %v5051_v21  ;;  %v3388_v21 = vcombine.low %v5187_v44, %v5190_v38  ;;  %v5562_v2 = vld [vmem:[#allocation8_spill] sm:$0xff] }
  0xbb   : > { %3919 = vmatprep.subr.bf16.mxu1 %v5559_v7 }
  0xc0   : > { %3828 = vmatmul.mubr.msk.bf16.gmra.mrb[16].mxu0 %vm715_vm4, %v4995_v22 }
  0xc1   : > { %3680 = vmatmul.mubr.msk.bf16.gmra.mrb[4].mxu1 %vm715_vm4, %v5560_v39  ;;  %3831 = vmatprep.mubr.msk.bf16.mxu0 %vm715_vm4, %v4999_v36 }
  0xc2   : > { %3683 = vmatprep.mubr.msk.bf16.mxu1 %vm715_vm4, %v5561_v32 }
  0xc8   : > { %3832 = vmatmul.mubr.msk.bf16.gmra.mrb[20].mxu0 %vm715_vm4, %v5010_v1 }
  0xc9   : > { %3684 = vmatmul.mubr.msk.bf16.gmra.mrb[8].mxu1 %vm715_vm4, %v4875_v16  ;;  %3835 = vmatprep.mubr.msk.bf16.mxu0 %vm715_vm4, %v5014_v5 }
  0xca   : > { %3687 = vmatprep.mubr.msk.bf16.mxu1 %vm715_vm4, %v4902_v15 }
  0xd0   : > { %3836 = vmatmul.mubr.msk.bf16.gmra.mrb[24].mxu0 %vm715_vm4, %v5018_v9 }
  0xd1   : > { %3688 = vmatmul.mubr.msk.bf16.gmra.mrb[12].mxu1 %vm715_vm4, %v4909_v52  ;;  %3839 = vmatprep.mubr.msk.bf16.mxu0 %vm715_vm4, %v5178_v48 }
  0xd2   : > { %3691 = vmatprep.mubr.msk.bf16.mxu1 %vm715_vm4, %v4928_v53 }
  0xd8   : > { %3840 = vmatmul.mubr.msk.bf16.gmra.mrb[28].mxu0 %vm715_vm4, %v3388_v21 }
  0xd9   : > { %3692 = vmatmul.mubr.msk.bf16.gmra.mrb[16].mxu1 %vm715_vm4, %v4932_v8  ;;  %3845 = vmatprep.mubr.msk.bf16.mxu0 %vm715_vm4, %v5562_v2 }
  0xda   : > { %3695 = vmatprep.mubr.msk.bf16.mxu1 %vm715_vm4, %v4977_v42 }
  0xe0   : > { %3846 = vmatmul.mubr.msk.bf16.vlgmr.msra.gmra.mrb[0].mxu0 %vm715_vm4, %v5563_v35 }
  0xe1   : > { %3696 = vmatmul.mubr.msk.bf16.gmra.mrb[20].mxu1 %vm715_vm4, %v4984_v34  ;;  %3878 = vmatpush3.bf16.msra.mxu0 %v2746_v61  ;;  %v2515_v61 = vshrl.u32 %v5190_v38, 16  ;;  %v5360_v38 = vld [vmem:[%s5488_s2] ss:$0 sm:$0xff] }
  0xe2   : > { %3699 = vmatprep.mubr.msk.bf16.mxu1 %vm715_vm4, %v5042_v63  ;;  %3849 = vmatprep.mubr.msk.bf16.mxu0 %vm715_vm4, %v5564_v43 }
  0xe3   : > { %v2517_v3 = vrot.slane %v2515_v61, 4 }
  0xe5   : > { %v2518_v40 = vor.u32 %v2517_v3, %v2513_v33 }
  0xe7   : > { %v2519_v60 = vrot.slane %v2518_v40, 4 }
  0xe8   : > { %3850 = vmatmul.mubr.msk.bf16.gmra.mrb[4].mxu0 %vm715_vm4, %v5565_v24 }
  0xe9   : > { %3700 = vmatmul.mubr.msk.bf16.gmra.mrb[24].mxu1 %vm715_vm4, %v5047_v18  ;;  %3853 = vmatprep.mubr.msk.bf16.mxu0 %vm715_vm4, %v5566_v55  ;;  %v2524_v6 = vsel %vm4472_vm5, %v2519_v60, %v2523_v26 }
  0xea   : > { %3703 = vmatprep.mubr.msk.bf16.mxu1 %vm715_vm4, %v5079_v46 }
  0xf0   : > { %3854 = vmatmul.mubr.msk.bf16.gmra.mrb[8].mxu0 %vm715_vm4, %v5567_v27 }
  0xf1   : > { %3704 = vmatmul.mubr.msk.bf16.gmra.mrb[28].mxu1 %vm715_vm4, %v5081_v37  ;;  %3857 = vmatprep.mubr.msk.bf16.mxu0 %vm715_vm4, %v5568_v25 }
  0xf2   : > { %3709 = vmatprep.mubr.msk.bf16.mxu1 %vm715_vm4, %v4478_v45  ;;  %v2502_v45 = vshrl.u32 %v5187_v44, 16 }
  0xf8   : > { %3858 = vmatmul.mubr.msk.bf16.gmra.mrb[12].mxu0 %vm715_vm4, %v5569_v51 }
  0xf9   : > { %3710 = vmatmul.mubr.msk.bf16.vlgmr.msra.gmra.mrb[0].mxu1 %vm715_vm4, %v4938_v58  ;;  %3861 = vmatprep.mubr.msk.bf16.mxu0 %vm715_vm4, %v5570_v49  ;;  %v5572_v58 = vld [vmem:[#allocation21_spill] sm:$0xff] }
  0xfa   : > { %3713 = vmatprep.mubr.msk.bf16.mxu1 %vm715_vm4, %v4971_v29  ;;  %3920 = vmatpush3.bf16.msra.mxu1 %v5559_v7  ;;  %v2504_v29 = vrot.slane %v2502_v45, 4 }
 0x100   : > { %3862 = vmatmul.mubr.msk.bf16.gmra.mrb[16].mxu0 %vm715_vm4, %v5571_v4 }
 0x101   : > { %3714 = vmatmul.mubr.msk.bf16.gmra.mrb[4].mxu1 %vm715_vm4, %v4981_v62  ;;  %3865 = vmatprep.mubr.msk.bf16.mxu0 %vm715_vm4, %v5572_v58  ;;  %v2508_v62 = vor.u32 %v2507_v28, %v2504_v29 }
 0x102   : > { %3717 = vmatprep.mubr.msk.bf16.mxu1 %vm715_vm4, %v5039_v12 }
 0x103   : > { %v2509_v12 = vrot.slane %v2508_v62, 4 }
 0x108   : > { %3866 = vmatmul.mubr.msk.bf16.gmra.mrb[20].mxu0 %vm715_vm4, %v5573_v10 }
 0x109   : > { %3718 = vmatmul.mubr.msk.bf16.gmra.mrb[8].mxu1 %vm715_vm4, %v5055_v56  ;;  %3869 = vmatprep.mubr.msk.bf16.mxu0 %vm715_vm4, %v4873_v13  ;;  %v2514_v56 = vsel %vm4472_vm5, %v2509_v12, %v2513_v33 }
 0x10a   : > { %3721 = vmatprep.mubr.msk.bf16.mxu1 %vm715_vm4, %v4947_v14  ;;  %v3406_v14 = vcombine.low %v2514_v56, %v2524_v6 }
 0x110   : > { %3870 = vmatmul.mubr.msk.bf16.gmra.mrb[24].mxu0 %vm715_vm4, %v4907_v23 }
 0x111   : > { %3722 = vmatmul.mubr.msk.bf16.gmra.mrb[12].mxu1 %vm715_vm4, %v4967_v59  ;;  %3873 = vmatprep.mubr.msk.bf16.mxu0 %vm715_vm4, %v5105_v19  ;;  %v4308_v59 = vmov 0.0  }
 0x112   : > { %3725 = vmatprep.mubr.msk.bf16.mxu1 %vm715_vm4, %v4975_v20  ;;  %3911 = vmatprep.subr.bf16.mxu1 %v4308_v59  ;;  %v4239_v20 = vld [vmem:[%s5489_s3 + $0x8] sm:$0xff]  }
 0x118   : > { %3874 = vmatmul.mubr.msk.bf16.gmra.mrb[28].mxu0 %vm715_vm4, %v3406_v14 }
 0x119   : > { %3726 = vmatmul.mubr.msk.bf16.gmra.mrb[16].mxu1 %vm715_vm4, %v4991_v17  ;;  %3879 = vmatprep.mubr.msk.bf16.mxu0 %vm715_vm4, %v5558_v0 }
 0x11a   : > { %3729 = vmatprep.mubr.msk.bf16.mxu1 %vm715_vm4, %v4995_v22 }
 0x120   : > { %3880 = vmatmul.mubr.msk.bf16.vlgmr.msra.gmra.mrb[0].mxu0 %vm715_vm4, %v5560_v39 }
 0x121   : > { %3730 = vmatmul.mubr.msk.bf16.gmra.mrb[20].mxu1 %vm715_vm4, %v4999_v36  ;;  %3883 = vmatprep.mubr.msk.bf16.mxu0 %vm715_vm4, %v5561_v32 }
 0x122   : > { %3733 = vmatprep.mubr.msk.bf16.mxu1 %vm715_vm4, %v5010_v1 }
 0x128   : > { %3884 = vmatmul.mubr.msk.bf16.gmra.mrb[4].mxu0 %vm715_vm4, %v4875_v16  ;;  %v3423_v16 = vrot.slane %v5187_v44, 9 }
 0x129   : > { %3734 = vmatmul.mubr.msk.bf16.gmra.mrb[24].mxu1 %vm715_vm4, %v5014_v5  ;;  %3887 = vmatprep.mubr.msk.bf16.mxu0 %vm715_vm4, %v4902_v15  ;;  %v2735_v15 = vrot.slane %v276_v30, 5 }
 0x12a   : > { %3737 = vmatprep.mubr.msk.bf16.mxu1 %vm715_vm4, %v5018_v9 }
 0x130   : > { %3888 = vmatmul.mubr.msk.bf16.gmra.mrb[8].mxu0 %vm715_vm4, %v4909_v52 }
 0x131   : > { %3738 = vmatmul.mubr.msk.bf16.gmra.mrb[28].mxu1 %vm715_vm4, %v5178_v48  ;;  %3891 = vmatprep.mubr.msk.bf16.mxu0 %vm715_vm4, %v4928_v53 }
 0x132   : > { %3763 = vmatprep.mubr.msk.bf16.mxu1 %vm715_vm4, %v5571_v4 }
 0x138   : > { %3892 = vmatmul.mubr.msk.bf16.gmra.mrb[12].mxu0 %vm715_vm4, %v4932_v8  ;;  %v4238_v8 = vld [vmem:[%s5489_s3] sm:$0xff]  }
 0x139   : > { %3764 = vmatmul.mubr.msk.bf16.vlgmr.msra.gmra.mrb[20].mxu1 %vm715_vm4, %v5572_v58  ;;  %3895 = vmatprep.mubr.msk.bf16.mxu0 %vm715_vm4, %v4977_v42 }
 0x13a   : > { %3767 = vmatprep.mubr.msk.bf16.mxu1 %vm715_vm4, %v5573_v10  ;;  %3912 = vmatpush3.bf16.msra.mxu1 %v4238_v8 }
 0x13b   : > { %3913 = vmatprep.subr.bf16.mxu1 %v4308_v59 }
 0x13e   : > { %3914 = vmatpush3.bf16.msra.mxu1 %v4239_v20 }
 0x140   : > { %3896 = vmatmul.mubr.msk.bf16.gmra.mrb[16].mxu0 %vm715_vm4, %v4984_v34 }
 0x141   : > { %3768 = vmatmul.mubr.msk.bf16.gmra.mrb[24].mxu1 %vm715_vm4, %v4873_v13  ;;  %3899 = vmatprep.mubr.msk.bf16.mxu0 %vm715_vm4, %v5042_v63  ;;  %v2734_v13 = vrot.slane %v2732_v41, 4 }
 0x142   : > { %3771 = vmatprep.mubr.msk.bf16.mxu1 %vm715_vm4, %v4907_v23  ;;  %v2733_v23 = vsel %vm4694_vm8, %v3423_v16, %v2732_v41 }
 0x143   : > { %v2736_v52 = vsel %vm4694_vm8, %v2734_v13, %v2735_v15 }
 0x144   : > { %v3425_v53 = vcombine.low %v2733_v23, %v2736_v52 }
 0x148   : > { %3900 = vmatmul.mubr.msk.bf16.gmra.mrb[20].mxu0 %vm715_vm4, %v5047_v18 }
 0x149   : > { %3772 = vmatmul.mubr.msk.bf16.gmra.mrb[28].mxu1 %vm715_vm4, %v5105_v19  ;;  %3903 = vmatprep.mubr.msk.bf16.mxu0 %vm715_vm4, %v5079_v46 }
 0x14a   : > { %3915 = vmatprep.mubr.msk.bf16.mxu1 %vm4309_vm9, %v4308_v59 }
 0x150   : > { %3904 = vmatmul.mubr.msk.bf16.gmra.mrb[24].mxu0 %vm715_vm4, %v5081_v37 }
 0x151   : > { %3907 = vmatprep.mubr.msk.bf16.mxu0 %vm715_vm4, %v5099_v50 }
 0x158   : > { %3908 = vmatmul.mubr.msk.bf16.gmra.mrb[28].mxu0 %vm715_vm4, %v3425_v53 }
 0x1cc   : > { %v3711_v47 = vpop.f32.mrb[0].mxu1 }
 0x1cd   : > { %v1696_v42 = vpop.f32.mrb[1].mxu1 }
 0x1ce   : > { %v3712_v34 = vpop.f32.mrb[2].mxu1 }
 0x1cf   : > { %v1699_v17 = vpop.f32.mrb[3].mxu1 }
 0x1d4   : > { %v3715_v22 = vpop.f32.mrb[4].mxu1 }
 0x1d5   : > { %v1712_v36 = vpop.f32.mrb[5].mxu1 }
 0x1d6   : > { %v3716_v1 = vpop.f32.mrb[6].mxu1 }
 0x1d7   : > { %v1715_v5 = vpop.f32.mrb[7].mxu1 }
 0x1dc   : > { %v3719_v9 = vpop.f32.mrb[8].mxu1 }
 0x1dd   : > { %v1728_v63 = vpop.f32.mrb[9].mxu1 }
 0x1de   : > { %v3720_v18 = vpop.f32.mrb[10].mxu1 }
 0x1df   : > { %v5339_v46 = vpop.f32.mrb[11].mxu1 }
 0x1e4   : > { %v5341_v37 = vpop.f32.mrb[12].mxu1 }
 0x1e5   : > { %v5343_v50 = vpop.f32.mrb[13].mxu1 }
 0x1e6   : > { %v5345_v19 = vpop.f32.mrb[14].mxu1 }
 0x1e7   : > { %v5347_v31 = vpop.f32.mrb[15].mxu1 }
 0x1ec   : > { %v5349_v0 = vpop.f32.mrb[16].mxu1 }
 0x1ed   : > { %v5351_v7 = vpop.f32.mrb[17].mxu1 }
 0x1ee   : > { %v5353_v39 = vpop.f32.mrb[18].mxu1 }
 0x1ef   : > { %v5355_v32 = vpop.f32.mrb[19].mxu1 }
 0x1f3   : > { %v3881_v48 = vpop.f32.mrb[0].mxu0 }
 0x1f4   : > { %v3921_v44 = vadd.f32 %v3881_v48, %v3711_v47  ;;  %v2782_v21 = vpop.f32.mrb[1].mxu0 }
 0x1f5   : > { %v3922_v2 = vadd.f32 %v2782_v21, %v1696_v42  ;;  %v3882_v35 = vpop.f32.mrb[2].mxu0 }
 0x1f6   : > { %v3923_v43 = vadd.f32 %v3882_v35, %v3712_v34  ;;  %v2785_v24 = vpop.f32.mrb[3].mxu0  ;;  %v2950_v55 = vadd.f32 %v3921_v44, %v5360_v38 }
 0x1f7   : > { %v2948_v27 = vadd.f32 %v3922_v2, %v5360_v38  ;;  %v3924_v25 = vadd.f32 %v2785_v24, %v1699_v17 }
 0x1f8   : > { %v2951_v49 = vadd.f32 %v3923_v43, %v5360_v38  ;;  %v2982_v45 = vmax.f32 %v2950_v55, 0.0 }
 0x1f9   : > { %v2980_v51 = vmax.f32 %v2948_v27, 0.0  ;;  %v2949_v4 = vadd.f32 %v3924_v25, %v5360_v38 }
 0x1fa   : > { %v2983_v28 = vmax.f32 %v2951_v49, 0.0  ;;  %v3016_v54 = vsel %vm3012_vm10, %v2982_v45, 0.0 }
 0x1fb   : > { %v2981_v57 = vmax.f32 %v2949_v4, 0.0  ;;  %v3885_v61 = vpop.f32.mrb[4].mxu0  ;;  %v3013_v29 = vsel %vm3012_vm10, %v2980_v51, 0.0 }
 0x1fc   : > { %v3925_v58 = vadd.f32 %v3885_v61, %v3715_v22  ;;  %v2798_v11 = vpop.f32.mrb[5].mxu0  ;;  %v3018_v6 = vsel %vm3012_vm10, %v2983_v28, 0.0 }
 0x1fd   : > { %v3014_v33 = vsel %vm3012_vm10, %v2981_v57, 0.0  ;;  %v3926_v3 = vadd.f32 %v2798_v11, %v1712_v36  ;;  %v3886_v30 = vpop.f32.mrb[6].mxu0 }
 0x1fe   : > { %v3015_v10 = vadd.f32 %v3014_v33, %v3013_v29  ;;  %v3927_v62 = vadd.f32 %v3886_v30, %v3716_v1  ;;  %v2801_v40 = vpop.f32.mrb[7].mxu0  ;;  %v2954_v12 = vadd.f32 %v3925_v58, %v5360_v38 }
 0x1ff   : > { %v2952_v60 = vadd.f32 %v3926_v3, %v5360_v38  ;;  %v3928_v26 = vadd.f32 %v2801_v40, %v1715_v5 }
 0x200   : > { %v3017_v56 = vadd.f32 %v3016_v54, %v3015_v10  ;;  %v2955_v41 = vadd.f32 %v3927_v62, %v5360_v38  ;;  %v2986_v15 = vmax.f32 %v2954_v12, 0.0 }
 0x201   : > { %v2984_v14 = vmax.f32 %v2952_v60, 0.0  ;;  %v2953_v16 = vadd.f32 %v3928_v26, %v5360_v38 }
 0x202   : > { %v3019_v13 = vadd.f32 %v3018_v6, %v3017_v56  ;;  %v2987_v47 = vmax.f32 %v2955_v41, 0.0  ;;  %v3024_v5 = vsel %vm3012_vm10, %v2986_v15, 0.0 }
 0x203   : > { %v3020_v23 = vsel %vm3012_vm10, %v2984_v14, 0.0  ;;  %v2985_v52 = vmax.f32 %v2953_v16, 0.0  ;;  %v3889_v53 = vpop.f32.mrb[8].mxu0 }
 0x204   : > { %v3021_v8 = vadd.f32 %v3020_v23, %v3019_v13  ;;  %v3929_v59 = vadd.f32 %v3889_v53, %v3719_v9  ;;  %v2814_v20 = vpop.f32.mrb[9].mxu0  ;;  %v3026_v9 = vsel %vm3012_vm10, %v2987_v47, 0.0 }
 0x205   : > { %v3022_v42 = vsel %vm3012_vm10, %v2985_v52, 0.0  ;;  %v3930_v34 = vadd.f32 %v2814_v20, %v1728_v63  ;;  %v3890_v17 = vpop.f32.mrb[10].mxu0 }
 0x206   : > { %v3023_v22 = vadd.f32 %v3022_v42, %v3021_v8  ;;  %v3931_v36 = vadd.f32 %v3890_v17, %v3720_v18  ;;  %v2817_v1 = vpop.f32.mrb[11].mxu0  ;;  %v2958_v48 = vadd.f32 %v3929_v59, %v5360_v38 }
 0x207   : > { %v2956_v44 = vadd.f32 %v3930_v34, %v5360_v38  ;;  %v3932_v21 = vadd.f32 %v2817_v1, %v5339_v46 }
 0x208   : > { %v3025_v2 = vadd.f32 %v3024_v5, %v3023_v22  ;;  %v2959_v43 = vadd.f32 %v3931_v36, %v5360_v38  ;;  %v2990_v55 = vmax.f32 %v2958_v48, 0.0 }
 0x209   : > { %v2988_v35 = vmax.f32 %v2956_v44, 0.0  ;;  %v2957_v63 = vadd.f32 %v3932_v21, %v5360_v38 }
 0x20a   : > { %v3027_v24 = vadd.f32 %v3026_v9, %v3025_v2  ;;  %v2991_v46 = vmax.f32 %v2959_v43, 0.0  ;;  %v3032_v30 = vsel %vm3012_vm10, %v2990_v55, 0.0 }
 0x20b   : > { %v3028_v18 = vsel %vm3012_vm10, %v2988_v35, 0.0  ;;  %v2989_v27 = vmax.f32 %v2957_v63, 0.0  ;;  %v3893_v25 = vpop.f32.mrb[12].mxu0 }
 0x20c   : > { %v3029_v51 = vadd.f32 %v3028_v18, %v3027_v24  ;;  %v3765_v49 = vpop.f32.mrb[20].mxu1  ;;  %v3933_v4 = vadd.f32 %v3893_v25, %v5341_v37  ;;  %v2830_v45 = vpop.f32.mrb[13].mxu0  ;;  %v3034_v12 = vsel %vm3012_vm10, %v2991_v46, 0.0 }
 0x20d   : > { %v3030_v57 = vsel %vm3012_vm10, %v2989_v27, 0.0  ;;  %v2004_v61 = vpop.f32.mrb[21].mxu1  ;;  %v3934_v58 = vadd.f32 %v2830_v45, %v5343_v50  ;;  %v3894_v11 = vpop.f32.mrb[14].mxu0 }
 0x20e   : > { %v3031_v29 = vadd.f32 %v3030_v57, %v3029_v51  ;;  %v3766_v28 = vpop.f32.mrb[22].mxu1  ;;  %v3935_v33 = vadd.f32 %v3894_v11, %v5345_v19  ;;  %v2833_v3 = vpop.f32.mrb[15].mxu0  ;;  %v2962_v10 = vadd.f32 %v3933_v4, %v5360_v38 }
 0x20f   : > { %v2960_v62 = vadd.f32 %v3934_v58, %v5360_v38  ;;  %v2007_v37 = vpop.f32.mrb[23].mxu1  ;;  %v3936_v40 = vadd.f32 %v2833_v3, %v5347_v31 }
 0x210   : > { %v3033_v54 = vadd.f32 %v3032_v30, %v3031_v29  ;;  %v2963_v50 = vadd.f32 %v3935_v33, %v5360_v38  ;;  %v2994_v19 = vmax.f32 %v2962_v10, 0.0 }
 0x211   : > { %v2992_v60 = vmax.f32 %v2960_v62, 0.0  ;;  %v2961_v26 = vadd.f32 %v3936_v40, %v5360_v38 }
 0x212   : > { %v3035_v56 = vadd.f32 %v3034_v12, %v3033_v54  ;;  %v2995_v31 = vmax.f32 %v2963_v50, 0.0  ;;  %v3040_v17 = vsel %vm3012_vm10, %v2994_v19, 0.0 }
 0x213   : > { %v3036_v6 = vsel %vm3012_vm10, %v2992_v60, 0.0  ;;  %v2993_v14 = vmax.f32 %v2961_v26, 0.0  ;;  %v3897_v41 = vpop.f32.mrb[16].mxu0 }
 0x214   : > { %v3037_v16 = vadd.f32 %v3036_v6, %v3035_v56  ;;  %v3769_v13 = vpop.f32.mrb[24].mxu1  ;;  %v3937_v15 = vadd.f32 %v3897_v41, %v5349_v0  ;;  %v2846_v23 = vpop.f32.mrb[17].mxu0  ;;  %v3042_v48 = vsel %vm3012_vm10, %v2995_v31, 0.0 }
 0x215   : > { %v3038_v52 = vsel %vm3012_vm10, %v2993_v14, 0.0  ;;  %v2020_v53 = vpop.f32.mrb[25].mxu1  ;;  %v3938_v8 = vadd.f32 %v2846_v23, %v5351_v7  ;;  %v3898_v59 = vpop.f32.mrb[18].mxu0 }
 0x216   : > { %v3039_v20 = vadd.f32 %v3038_v52, %v3037_v16  ;;  %v3770_v47 = vpop.f32.mrb[26].mxu1  ;;  %v3939_v42 = vadd.f32 %v3898_v59, %v5353_v39  ;;  %v2849_v34 = vpop.f32.mrb[19].mxu0  ;;  %v2966_v22 = vadd.f32 %v3937_v15, %v5360_v38 }
 0x217   : > { %v2964_v36 = vadd.f32 %v3938_v8, %v5360_v38  ;;  %v2023_v0 = vpop.f32.mrb[27].mxu1  ;;  %v3940_v1 = vadd.f32 %v2849_v34, %v5355_v32 }
 0x218   : > { %v3041_v5 = vadd.f32 %v3040_v17, %v3039_v20  ;;  %v2967_v7 = vadd.f32 %v3939_v42, %v5360_v38  ;;  %v2998_v39 = vmax.f32 %v2966_v22, 0.0 }
 0x219   : > { %v2996_v44 = vmax.f32 %v2964_v36, 0.0  ;;  %v2965_v21 = vadd.f32 %v3940_v1, %v5360_v38 }
 0x21a   : > { %v3043_v2 = vadd.f32 %v3042_v48, %v3041_v5  ;;  %v2999_v27 = vmax.f32 %v2967_v7, 0.0  ;;  %v3048_v11 = vsel %vm3012_vm10, %v2998_v39, 0.0 }
 0x21b   : > { %v3044_v9 = vsel %vm3012_vm10, %v2996_v44, 0.0  ;;  %v2997_v35 = vmax.f32 %v2965_v21, 0.0  ;;  %v3901_v43 = vpop.f32.mrb[20].mxu0 }
 0x21c   : > { %v3045_v63 = vadd.f32 %v3044_v9, %v3043_v2  ;;  %v3773_v24 = vpop.f32.mrb[28].mxu1  ;;  %v3941_v55 = vadd.f32 %v3901_v43, %v3765_v49  ;;  %v2862_v18 = vpop.f32.mrb[21].mxu0  ;;  %v3050_v10 = vsel %vm3012_vm10, %v2999_v27, 0.0 }
 0x21d   : > { %v3046_v32 = vsel %vm3012_vm10, %v2997_v35, 0.0  ;;  %v2036_v25 = vpop.f32.mrb[29].mxu1  ;;  %v3942_v51 = vadd.f32 %v2862_v18, %v2004_v61  ;;  %v3902_v4 = vpop.f32.mrb[22].mxu0 }
 0x21e   : > { %v3047_v45 = vadd.f32 %v3046_v32, %v3045_v63  ;;  %v3774_v46 = vpop.f32.mrb[30].mxu1  ;;  %v3943_v57 = vadd.f32 %v3902_v4, %v3766_v28  ;;  %v2865_v58 = vpop.f32.mrb[23].mxu0  ;;  %v2970_v29 = vadd.f32 %v3941_v55, %v5360_v38 }
 0x21f   : > { %v2968_v33 = vadd.f32 %v3942_v51, %v5360_v38  ;;  %v2039_v3 = vpop.f32.mrb[31].mxu1  ;;  %v3944_v30 = vadd.f32 %v2865_v58, %v2007_v37 }
 0x220   : > { %v3049_v49 = vadd.f32 %v3048_v11, %v3047_v45  ;;  %v2971_v40 = vadd.f32 %v3943_v57, %v5360_v38  ;;  %v3002_v12 = vmax.f32 %v2970_v29, 0.0 }
 0x221   : > { %v3000_v62 = vmax.f32 %v2968_v33, 0.0  ;;  %v2969_v61 = vadd.f32 %v3944_v30, %v5360_v38 }
 0x222   : > { %v3051_v54 = vadd.f32 %v3050_v10, %v3049_v49  ;;  %v3003_v6 = vmax.f32 %v2971_v40, 0.0  ;;  %v3056_v31 = vsel %vm3012_vm10, %v3002_v12, 0.0 }
 0x223   : > { %v3052_v28 = vsel %vm3012_vm10, %v3000_v62, 0.0  ;;  %v3001_v60 = vmax.f32 %v2969_v61, 0.0  ;;  %v3905_v50 = vpop.f32.mrb[24].mxu0 }
 0x224   : > { %v3053_v26 = vadd.f32 %v3052_v28, %v3051_v54  ;;  %v3945_v56 = vadd.f32 %v3905_v50, %v3769_v13  ;;  %v2878_v19 = vpop.f32.mrb[25].mxu0  ;;  %v3058_v42 = vsel %vm3012_vm10, %v3003_v6, 0.0  ;;  %v3088_v50 = vld [vmem:[%s5490_s4] sm:$0x1] }
 0x225   : > { %v3054_v37 = vsel %vm3012_vm10, %v3001_v60, 0.0  ;;  %v3946_v14 = vadd.f32 %v2878_v19, %v2020_v53  ;;  %v3906_v41 = vpop.f32.mrb[26].mxu0 }
 0x226   : > { %v3055_v16 = vadd.f32 %v3054_v37, %v3053_v26  ;;  %v3947_v15 = vadd.f32 %v3906_v41, %v3770_v47  ;;  %v2881_v23 = vpop.f32.mrb[27].mxu0  ;;  %v2974_v52 = vadd.f32 %v3945_v56, %v5360_v38 }
 0x227   : > { %v2972_v8 = vadd.f32 %v3946_v14, %v5360_v38  ;;  %v3948_v59 = vadd.f32 %v2881_v23, %v2023_v0 }
 0x228   : > { %v3057_v20 = vadd.f32 %v3056_v31, %v3055_v16  ;;  %v2975_v34 = vadd.f32 %v3947_v15, %v5360_v38  ;;  %v3006_v22 = vmax.f32 %v2974_v52, 0.0 }
 0x229   : > { %v3004_v13 = vmax.f32 %v2972_v8, 0.0  ;;  %v2973_v17 = vadd.f32 %v3948_v59, %v5360_v38 }
 0x22a   : > { %v3059_v53 = vadd.f32 %v3058_v42, %v3057_v20  ;;  %v3007_v7 = vmax.f32 %v2975_v34, 0.0  ;;  %v3064_v43 = vsel %vm3012_vm10, %v3006_v22, 0.0 }
 0x22b   : > { %v3060_v47 = vsel %vm3012_vm10, %v3004_v13, 0.0  ;;  %v3005_v36 = vmax.f32 %v2973_v17, 0.0  ;;  %v3909_v1 = vpop.f32.mrb[28].mxu0 }
 0x22c   : > { %v3061_v5 = vadd.f32 %v3060_v47, %v3059_v53  ;;  %v3949_v48 = vadd.f32 %v3909_v1, %v3773_v24  ;;  %v2894_v44 = vpop.f32.mrb[29].mxu0  ;;  %v3066_v32 = vsel %vm3012_vm10, %v3007_v7, 0.0 }
 0x22d   : > { %v3062_v0 = vsel %vm3012_vm10, %v3005_v36, 0.0  ;;  %v3950_v21 = vadd.f32 %v2894_v44, %v2036_v25  ;;  %v3910_v2 = vpop.f32.mrb[30].mxu0 }
 0x22e   : > { %v3063_v39 = vadd.f32 %v3062_v0, %v3061_v5  ;;  %v3951_v9 = vadd.f32 %v3910_v2, %v3774_v46  ;;  %v2897_v35 = vpop.f32.mrb[31].mxu0  ;;  %v2978_v63 = vadd.f32 %v3949_v48, %v5360_v38 }
 0x22f   : > { %v2976_v55 = vadd.f32 %v3950_v21, %v5360_v38  ;;  %v3952_v18 = vadd.f32 %v2897_v35, %v2039_v3 }
 0x230   : > { %v3065_v27 = vadd.f32 %v3064_v43, %v3063_v39  ;;  %v2979_v51 = vadd.f32 %v3951_v9, %v5360_v38  ;;  %v3010_v45 = vmax.f32 %v2978_v63, 0.0 }
 0x231   : > { %v3008_v24 = vmax.f32 %v2976_v55, 0.0  ;;  %v2977_v4 = vadd.f32 %v3952_v18, %v5360_v38 }
 0x232   : > { %v3067_v25 = vadd.f32 %v3066_v32, %v3065_v27  ;;  %v3011_v11 = vmax.f32 %v2979_v51, 0.0  ;;  %v3072_v3 = vsel %vm3012_vm10, %v3010_v45, 0.0 }
 0x233   : > { %v3068_v46 = vsel %vm3012_vm10, %v3008_v24, 0.0  ;;  %v3009_v57 = vmax.f32 %v2977_v4, 0.0 }
 0x234   : > { %v3069_v58 = vadd.f32 %v3068_v46, %v3067_v25  ;;  %v3074_v49 = vsel %vm3012_vm10, %v3011_v11, 0.0 }
 0x235   : > { %v3070_v29 = vsel %vm3012_vm10, %v3009_v57, 0.0 }
 0x236   : > { %v3071_v33 = vadd.f32 %v3070_v29, %v3069_v58 }
 0x238   : > { %v3073_v30 = vadd.f32 %v3072_v3, %v3071_v33 }
 0x23a   : > { %v3075_v10 = vadd.f32 %v3074_v49, %v3073_v30 }
 0x23c   : > { %v3076_v62 = vrot.slane %v3075_v10, 4 }
 0x23e   : > { %v3077_v38 = vadd.f32 %v3076_v62, %v3075_v10 }
 0x240   : > { %v3078_v40 = vrot.slane %v3077_v38, 2 }
 0x242   : > { %v3079_v61 = vadd.f32 %v3078_v40, %v3077_v38 }
 0x244   : > { %v3080_v54 = vrot.slane %v3079_v61, 1 }
 0x246   : > { %v3081_v12 = vadd.f32 %v3080_v54, %v3079_v61 }
 0x248   : > { %v3082_v28 = vmul.f32 0.00390625, %v3081_v12 }
 0x24a   : > { %v3083_v60 = vpack.c.bf16 %v3082_v28, %v3082_v28 }
 0x24c   : > { %3916 = vmatmul.mubr.msk.bf16.vlgmr.msra.gmra.mrb[32].mxu1 %vm3012_vm10, %v3083_v60 }
 0x31f   : > { %v3138_v26 = vpop.f32.mrb[32].mxu1 }
 0x320   : > { %v3139_v56 = vadd.f32 %v3138_v26, %v3088_v50  ;;  %v3917_v19 = vpop.f32.mrb[33].mxu1 }
 0x321   : > { %v3141_v6 = vpop.f32.mrb[34].mxu1 }
 0x322   : > { %3144 = vst [vmem:[%s216_s6] sm:$0x1] %v3139_v56  ;;  %v3918_v37 = vpop.f32.mrb[35].mxu1 }
 0x323   : > { %4256 = shalt.err (!%p4253_p3)
}
 0x324   : > { %s4257_s15 = scalar_lea.hbm %s5444_s10, 16  ;;  %s4261_s23 = scalar_lea.hbm %s5491_s5, 32 }
 0x325   : > { %p4258_p4 = scmp.ne.s32.totalorder %s5444_s10, %s4257_s15  ;;  %p4262_p9 = scmp.lt.u32.totalorder %s5444_s10, %s5491_s5 }
 0x326   : > { %p4263_p10 = scmp.lt.u32.totalorder %s4261_s23, %s4257_s15  ;;  %p4265_p12 = scmp.lt.u32.totalorder %s4257_s15, %s5444_s10 }
 0x327   : > { %p4259_p7 = pnand %p4258_p4, %p4379_p5 }
 0x328   : > { %p4264_p11 = por %p4263_p10, %p4262_p9 }
 0x329   : > { %p4260_p8 = pneg %p4259_p7 }
 0x32a   : > { %p4266_p13 = por %p4265_p12, %p4264_p11 }
 0x32c   : > { %p4267_p0 = pnand %p4266_p13, %p4260_p8 }
 0x32e   : > { %4270 = shalt.err (!%p4267_p0)
}
 0x32f   : > { %4178 = dma.vmem_to_hbm [thread:$0]  (%p4379_p5), %s5446_s7, 16, %s5444_s10, %s3146_s11  }
 0x330 PF: > { %p4184_p1 = scmp.ge.s32.totalorder %s4305_s21, 2  ;;  %s3170_s30 = sand.u32 1, %s4293_s18  }
 0x331   : > { %s3171_s6 = scalar_lea.sflag [#allocation3], %s3170_s30 }
 0x332   : > { %p4181_p2 = pnand %p4184_p1, %p4383_p6 }
 0x334   : > { %4288 = dma.done.wait (!%p4181_p2), %s3171_s6, 16  }
 0x335   : > { %4290 = vsyncadd (!%p4181_p2), %s3171_s6, 4294967280  ;;  %p15_p3 = scmp.ge.s32.totalorder %s4366_s24, 4   ;;  %s5574_s18 = smov %s4297_s19 }
 0x336   : > { %s5575_s19 = smov %s4301_s20  ;;  %s5576_s20 = smov %s4377_s27 }
 0x337   : > { %s5577_s21 = smov %s4366_s24  ;;  %17 = sbr.rel (!%p15_p3) target bundleno = 3 (0x3), region = 83 }
 0x33e   :  { %3175 = vsyncpa [#allocation3], 1 }
 0x33f   :  { %3177 = vsyncpa [#allocation3 + $0x1], 1 }

</bundles_post_ra>
